<compile_context>
chip_gen: v6e
topology: v6e:2x2x1
jax: 0.10.0
libtpu: 0.0.40
codegen_flags: <defaults>
</compile_context>

<pallas_src>
import functools
import math

import jax
import jax.numpy as jnp
from jax import lax
from jax.experimental import pallas as pl
from jax.experimental.pallas import tpu as pltpu


_LOG_EPS = math.log(1e-6)   # == torch.log(0 + 1e-6) for padding-masked in-window columns
_NEG_BIG = -1e30            # out-of-window columns: exp() underflows to exactly 0


# ----------------------------------------------------------------------------
# Fused kernel: QKV projection (all heads) + sliding-window attention + ReLU
#               + folded multi-head output projection + output mask.
# ----------------------------------------------------------------------------
def _fused_mha_kernel(xq_ref, xkv_ref, pmh_ref, pmc_ref, band_ref,
                      wq_ref, wkv_ref, woc_ref, b_ref, o_ref,
                      q_sc, kv_sc, ctx_sc, *, H, c1, c2, c3, half, chunk):
    i = pl.program_id(0)
    u_len = chunk + 2 * half
    start = pl.multiple_of(i * chunk, chunk)          # lane-aligned window start

    xw = xkv_ref[:, pl.ds(start, u_len)]              # (C_in+1, u_len), last row = ones
    pmw = pmh_ref[:, pl.ds(start, u_len)]             # (1, u_len) padding mask (halo)

    # Q for all heads against the lane-aligned center chunk (scale pre-folded).
    q_sc[...] = jnp.dot(wq_ref[...], xq_ref[...], preferred_element_type=jnp.float32)

    # K/V for all heads against the halo window.  V rows are pre-masked by the
    # padding mask: V @ (att * pm)^T == (V * pm) @ att^T, so this replaces the
    # per-head full-tile `att * pm` multiply with a tiny (H*c3, u_len) one.
    kv = jnp.dot(wkv_ref[...], xw, preferred_element_type=jnp.float32)
    kv_sc[: H * c2, :] = kv[: H * c2, :]
    kv_sc[H * c2:, :] = kv[H * c2:, :] * pmw

    # Chunk-invariant additive mask: resident band mask (+0 in window, -1e30
    # outside) plus the padding-mask term (log(1e-6) where pm == 0).  Built
    # ONCE per chunk, shared by all heads.
    add = band_ref[...] + jnp.where(pmw > 0.0, 0.0, _LOG_EPS)   # (chunk, u_len)

    def head_body(h, carry):
        qr = pl.multiple_of(h * c1, c1)
        kr = pl.multiple_of(h * c2, c2)
        vr = pl.multiple_of(H * c2 + h * c3, math.gcd(H * c2, c3))
        cr = pl.multiple_of(h * c3, c3)

        q = q_sc[pl.ds(qr, c1), :]                    # (c1, chunk)
        k = kv_sc[pl.ds(kr, c2), :]                   # (c2, u_len)
        v = kv_sc[pl.ds(vr, c3), :]                   # (c3, u_len), padding-masked

        # Energies between every query of the chunk and the extended window;
        # the sliding window for chunk-local query r is columns [r, r + bl).
        energy = lax.dot_general(q, k, (((0,), (0,)), ((), ())),
                                 preferred_element_type=jnp.float32)   # (chunk, u_len)
        logits = energy + add
        m = jnp.max(logits, axis=-1, keepdims=True)
        p = jnp.exp(logits - m)                       # out-of-window -> exactly 0
        s = jnp.sum(p, axis=-1, keepdims=True)        # >= 1, well conditioned
        att = p * pl.reciprocal(s)                    # exact reciprocal

        ctx = lax.dot_general(v, att, (((1,), (1,)), ((), ())),
                              preferred_element_type=jnp.float32)      # (c3, chunk)
        ctx_sc[pl.ds(cr, c3), :] = jnp.maximum(ctx, 0.0)               # ReLU
        return carry

    lax.fori_loop(0, H, head_body, 0)

    # Folded multi-head output: woc = [wc_1@wo_1 | ... | wc_H@wo_H]  (v_dim, H*c3)
    head_sum = jnp.dot(woc_ref[...], ctx_sc[...], preferred_element_type=jnp.float32)
    # (sum_h wc_h@wo_h@relu(ctx_h) + sum_h wc_h@bo_h) * mask + bc
    o_ref[...] = (head_sum + b_ref[:, 0:1]) * pmc_ref[...] + b_ref[:, 1:2]


# ----------------------------------------------------------------------------
# Wrapper: MultiHeadAttLayer.forward (sliding_att, encoder, eval mode)
# ----------------------------------------------------------------------------
def multi_head_att_layer_forward(x1, x2, mask, params, bl, stage="encoder"):
    # x1, x2: (1, C, L); mask: (1, Cm, L)  — PyTorch NCL convention, N == 1.
    assert stage == "encoder"   # TODO(synk): decoder routes value from x2.
    B, c_in, L = x1.shape
    assert B == 1
    del x2
    f32 = jnp.float32
    hi = lax.Precision.HIGHEST

    wq, bq = params["wq"], params["bq"]        # (H, c1, q_dim), (H, c1, 1)
    wk, bk = params["wk"], params["bk"]
    wv, bv = params["wv"], params["bv"]
    wo, bo = params["wo"], params["bo"]        # (H, v_dim, c3), (H, v_dim, 1)
    wc, bc = params["wc"], params["bc"]        # (v_dim, H*v_dim), (v_dim, 1)

    H, c1, _ = wq.shape
    c2, c3 = wk.shape[1], wv.shape[1]
    v_dim = wo.shape[1]
    v_out = wc.shape[0]

    # ---- parameter folding (tiny, weights only) -----------------------------
    scale = 1.0 / math.sqrt(c1)                # softmax scale folded into Wq/bq
    wq_aug = (jnp.concatenate([wq, bq], axis=2).astype(f32) * scale
              ).reshape(H * c1, c_in + 1)                               # (H*c1, c_in+1)
    wk_aug = jnp.concatenate([wk, bk], axis=2).astype(f32).reshape(H * c2, c_in + 1)
    wv_aug = jnp.concatenate([wv, bv], axis=2).astype(f32).reshape(H * c3, c_in + 1)
    wkv_aug = jnp.concatenate([wk_aug, wv_aug], axis=0)                 # (H*(c2+c3), c_in+1)

    wc_heads = wc.astype(f32).reshape(v_out, H, v_dim)                  # (v_out, H, v_dim)
    woc_full = jnp.einsum("ohv,hvc->ohc", wc_heads, wo.astype(f32),
                          precision=hi).reshape(v_out, H * c3)          # (v_out, H*c3)
    hbias = jnp.einsum("ohv,hvk->ok", wc_heads, bo.astype(f32), precision=hi)  # (v_out, 1)
    biases = jnp.concatenate([hbias, bc.astype(f32)], axis=1)           # (v_out, 2)

    # ---- activation layout: ones-row (bias fold), halo + lane-dense chunks --
    half = bl // 2
    chunk = (128 // math.gcd(128, bl)) * bl    # lcm(bl, 128): keep at the minimum
    u_len = chunk + 2 * half
    n_chunks = max(1, -(-L // chunk))
    Lc = n_chunks * chunk
    Lx = Lc + 2 * half

    x_aug = jnp.concatenate([x1[0].astype(f32), jnp.ones((1, L), f32)], axis=0)
    xq = jnp.pad(x_aug, ((0, 0), (0, Lc - L)))                   # (c_in+1, Lc), no halo
    xkv = jnp.pad(x_aug, ((0, 0), (half, Lx - L - half)))        # (c_in+1, Lx), halo
    pm = mask[0, 0:1, :].astype(f32)
    pm_c = jnp.pad(pm, ((0, 0), (0, Lc - L)))                    # (1, Lc) output mask
    pm_h = jnp.pad(pm, ((0, 0), (half, Lx - L - half)))          # (1, Lx) window mask

    # Precomputed sliding-window band mask (chunk-invariant, head-invariant).
    rr = jnp.arange(chunk, dtype=jnp.int32)[:, None]
    uu = jnp.arange(u_len, dtype=jnp.int32)[None, :]
    band_add = jnp.where((uu >= rr) & (uu < rr + bl), 0.0, _NEG_BIG).astype(f32)

    kern = functools.partial(_fused_mha_kernel, H=H, c1=c1, c2=c2, c3=c3,
                             half=half, chunk=chunk)
    out = pl.pallas_call(
        kern,
        grid=(n_chunks,),
        in_specs=[
            pl.BlockSpec((c_in + 1, chunk), lambda i: (0, i)),          # xq (streamed)
            pl.BlockSpec((c_in + 1, Lx), lambda i: (0, 0)),             # xkv (resident)
            pl.BlockSpec((1, Lx), lambda i: (0, 0)),                    # pad mask, halo
            pl.BlockSpec((1, chunk), lambda i: (0, i)),                 # pad mask, center
            pl.BlockSpec((chunk, u_len), lambda i: (0, 0)),             # band add-mask
            pl.BlockSpec((H * c1, c_in + 1), lambda i: (0, 0)),         # Wq (scale folded)
            pl.BlockSpec((H * (c2 + c3), c_in + 1), lambda i: (0, 0)),  # Wk|Wv stacked
            pl.BlockSpec((v_out, H * c3), lambda i: (0, 0)),            # folded output map
            pl.BlockSpec((v_out, 2), lambda i: (0, 0)),                 # folded biases
        ],
        out_specs=pl.BlockSpec((v_out, chunk), lambda i: (0, i)),       # (v_dim, L) layout
        out_shape=jax.ShapeDtypeStruct((v_out, Lc), f32),
        scratch_shapes=[
            pltpu.VMEM((H * c1, chunk), f32),          # Q, all heads
            pltpu.VMEM((H * (c2 + c3), u_len), f32),   # K|V, all heads (V pre-masked)
            pltpu.VMEM((H * c3, chunk), f32),          # stacked ReLU'd contexts
        ],
        compiler_params=pltpu.CompilerParams(
            dimension_semantics=("parallel",)),
    )(xq, xkv, pm_h, pm_c, band_add, wq_aug, wkv_aug, woc_full, biases)

    return out[:, :L][None]                                            # (1, v_dim, L)


# ----------------------------------------------------------------------------
# Pure-JAX reference mirroring the PyTorch module (for correctness check)
# ----------------------------------------------------------------------------
def _ref_att_layer(x1, x2, mask, wq, bq, wk, bk, wv, bv, wo, bo, bl, stage="encoder"):
    hi = lax.Precision.HIGHEST

    def conv1x1(x, w, b):
        return jnp.einsum("oc,bcl->bol", w, x, precision=hi) + b[None]

    q = conv1x1(x1, wq, bq)
    k = conv1x1(x1, wk, bk)
    v = conv1x1(x2 if stage == "decoder" else x1, wv, bv)

    B, c1, L = q.shape
    nb = L // bl
    if L % bl != 0:
        pad = bl - L % bl
        q = jnp.pad(q, ((0, 0), (0, 0), (0, pad)))
        k = jnp.pad(k, ((0, 0), (0, 0), (0, pad)))
        v = jnp.pad(v, ((0, 0), (0, 0), (0, pad)))
        nb += 1
    Lp = nb * bl
    pmask = jnp.concatenate(
        [jnp.ones((B, 1, L), jnp.float32) * mask[:, 0:1, :],
         jnp.zeros((B, 1, Lp - L), jnp.float32)], axis=-1)

    half = bl // 2
    W = bl + 2 * half
    k = jnp.pad(k, ((0, 0), (0, 0), (half, half)))
    v = jnp.pad(v, ((0, 0), (0, 0), (half, half)))
    pmask = jnp.pad(pmask, ((0, 0), (0, 0), (half, half)))

    qb = q.reshape(B, c1, nb, bl).transpose(0, 2, 1, 3).reshape(B * nb, c1, bl)
    kb = jnp.concatenate([k[:, :, i * bl:i * bl + W] for i in range(nb)], axis=0)
    vb = jnp.concatenate([v[:, :, i * bl:i * bl + W] for i in range(nb)], axis=0)
    mb = jnp.concatenate([pmask[:, :, i * bl:i * bl + W] for i in range(nb)], axis=0)

    rows = jnp.arange(bl)[:, None]
    cols = jnp.arange(W)[None, :]
    # Standard ASFormer sliding window: row i attends to columns [i, i + bl).
    wmask = ((cols >= rows) & (cols < rows + bl)).astype(jnp.float32)
    fm = wmask[None] * mb

    energy = jnp.einsum("bcq,bck->bqk", qb, kb, precision=hi) / jnp.sqrt(jnp.float32(c1))
    att = jax.nn.softmax(energy + jnp.log(fm + 1e-6), axis=-1) * fm
    out = jnp.einsum("bck,bqk->bcq", vb, att, precision=hi)
    out = jax.nn.relu(out)
    out = jnp.einsum("oc,bcl->bol", wo, out, precision=hi) + bo[None]
    out = out.reshape(B, nb, -1, bl).transpose(0, 2, 1, 3).reshape(B, -1, Lp)
    out = out[:, :, :L]
    return out * mask[:, 0:1, :]


def ref_multi_head_forward(x1, x2, mask, params, bl, stage="encoder"):
    hi = lax.Precision.HIGHEST
    H = params["wq"].shape[0]
    heads = [_ref_att_layer(x1, x2, mask,
                            params["wq"][h], params["bq"][h],
                            params["wk"][h], params["bk"][h],
                            params["wv"][h], params["bv"][h],
                            params["wo"][h], params["bo"][h], bl, stage)
             for h in range(H)]
    cat = jnp.concatenate(heads, axis=1)          # (B, H*v_dim, L)
    # Dropout(p=0.5) is identity in eval mode.
    return jnp.einsum("oc,bcl->bol", params["wc"], cat, precision=hi) + params["bc"][None]


# ----------------------------------------------------------------------------
if __name__ == "__main__":
    # Module config (small): q_dim=k_dim=v_dim=16, r1=r2=r3=2, bl=16, 3 heads.
    q_dim = k_dim = v_dim = 16
    r1 = r2 = r3 = 2
    bl = 16
    num_head = 3
    B, L = 1, 300                 # not a multiple of bl nor of the 128-frame chunk
    c1, c2, c3 = q_dim // r1, k_dim // r2, v_dim // r3

    key = jax.random.PRNGKey(0)
    ks = jax.random.split(key, 12)

    def rnd(k, shape, scale):
        return scale * jax.random.normal(k, shape, jnp.float32)

    params = {
        "wq": rnd(ks[0], (num_head, c1, q_dim), 0.2),
        "bq": rnd(ks[1], (num_head, c1, 1), 0.1),
        "wk": rnd(ks[2], (num_head, c2, k_dim), 0.2),
        "bk": rnd(ks[3], (num_head, c2, 1), 0.1),
        "wv": rnd(ks[4], (num_head, c3, v_dim), 0.2),
        "bv": rnd(ks[5], (num_head, c3, 1), 0.1),
        "wo": rnd(ks[6], (num_head, v_dim, c3), 0.2),
        "bo": rnd(ks[7], (num_head, v_dim, 1), 0.1),
        "wc": rnd(ks[8], (v_dim, v_dim * num_head), 0.2),
        "bc": rnd(ks[9], (v_dim, 1), 0.1),
    }

    x1 = jax.random.normal(ks[10], (B, q_dim, L), jnp.float32)
    x2 = jax.random.normal(ks[11], (B, v_dim, L), jnp.float32)   # unused (encoder)
    # mask: valid for the first 250 frames (sequence padding afterwards)
    mask = (jnp.arange(L) < 250).astype(jnp.float32)[None, None, :]   # (1, 1, L)

    fwd = jax.jit(multi_head_att_layer_forward, static_argnames=("bl", "stage"))
    out = jax.block_until_ready(fwd(x1, x2, mask, params, bl=bl, stage="encoder"))

    ref = ref_multi_head_forward(x1, x2, mask, params, bl, stage="encoder")
    assert out.shape == (B, v_dim, L)
    err = float(jnp.max(jnp.abs(out - ref)))
    # Tolerance covers the -1e30 out-of-window handling (the reference's
    # softmax denominator includes 1e-6-scaled out-of-window terms) and the
    # binarized padding-mask additive term; everything else matches ~1e-5.
    assert jnp.allclose(out, ref, atol=5e-3, rtol=5e-3), f"max abs err {err}"
    print("KERNEL_OK")
</pallas_src>

<mosaic_0001>
module attributes {stable_mosaic.version = 11 : i64} {
  func.func @_fused_mha_kernel(%arg0: i32, %arg1: memref<17x128xf32, #tpu.memory_space<vmem>>, %arg2: memref<17x400xf32, #tpu.memory_space<vmem>>, %arg3: memref<1x400xf32, #tpu.memory_space<vmem>>, %arg4: memref<1x128xf32, #tpu.memory_space<vmem>>, %arg5: memref<128x144xf32, #tpu.memory_space<vmem>>, %arg6: memref<24x17xf32, #tpu.memory_space<vmem>>, %arg7: memref<48x17xf32, #tpu.memory_space<vmem>>, %arg8: memref<16x24xf32, #tpu.memory_space<vmem>>, %arg9: memref<16x2xf32, #tpu.memory_space<vmem>>, %arg10: memref<16x128xf32, #tpu.memory_space<vmem>>, %arg11: memref<24x128xf32, #tpu.memory_space<vmem>>, %arg12: memref<48x144xf32, #tpu.memory_space<vmem>>, %arg13: memref<24x128xf32, #tpu.memory_space<vmem>>) attributes {dimension_semantics = [#tpu.dimension_semantics<parallel>], iteration_bounds = array<i64: 3>, scalar_prefetch = 0 : i64, scratch_operands = 3 : i64, tpu.core_type = #tpu.core_type<tc>, window_params = [{transform_indices = @transform_0, window_bounds = array<i64: 17, 128>}, {pipeline_mode = #tpu.pipeline_mode<synchronous>, transform_indices = @transform_1, window_bounds = array<i64: 17, 400>}, {pipeline_mode = #tpu.pipeline_mode<synchronous>, transform_indices = @transform_2, window_bounds = array<i64: 1, 400>}, {transform_indices = @transform_3, window_bounds = array<i64: 1, 128>}, {pipeline_mode = #tpu.pipeline_mode<synchronous>, transform_indices = @transform_4, window_bounds = array<i64: 128, 144>}, {pipeline_mode = #tpu.pipeline_mode<synchronous>, transform_indices = @transform_5, window_bounds = array<i64: 24, 17>}, {pipeline_mode = #tpu.pipeline_mode<synchronous>, transform_indices = @transform_6, window_bounds = array<i64: 48, 17>}, {pipeline_mode = #tpu.pipeline_mode<synchronous>, transform_indices = @transform_7, window_bounds = array<i64: 16, 24>}, {pipeline_mode = #tpu.pipeline_mode<synchronous>, transform_indices = @transform_8, window_bounds = array<i64: 16, 2>}, {transform_indices = @transform_9, window_bounds = array<i64: 16, 128>}]} {
    %c128_i32 = arith.constant 128 : i32
    %0 = arith.muli %arg0, %c128_i32 : i32
    %1 = tpu.assume_multiple %0, 128 : i32
    %c0 = arith.constant 0 : index
    %2 = arith.index_cast %1 : i32 to index
    %3 = vector.load %arg2[%c0, %2] : memref<17x400xf32, #tpu.memory_space<vmem>>, vector<17x144xf32>
    %c0_0 = arith.constant 0 : index
    %4 = arith.index_cast %1 : i32 to index
    %5 = vector.load %arg3[%c0_0, %4] : memref<1x400xf32, #tpu.memory_space<vmem>>, vector<1x144xf32>
    %c0_1 = arith.constant 0 : index
    %c0_2 = arith.constant 0 : index
    %6 = vector.load %arg6[%c0_1, %c0_2] : memref<24x17xf32, #tpu.memory_space<vmem>>, vector<24x17xf32>
    %c0_3 = arith.constant 0 : index
    %c0_4 = arith.constant 0 : index
    %7 = vector.load %arg1[%c0_3, %c0_4] : memref<17x128xf32, #tpu.memory_space<vmem>>, vector<17x128xf32>
    %cst = arith.constant dense<0.000000e+00> : vector<24x128xf32>
    %8 = tpu.matmul %6, %7, %cst {dimension_numbers = #tpu.dot_dimension_numbers<[1], [0], [0], [1], [0, 0, 1, 1], [], []>} : vector<24x17xf32>, vector<17x128xf32>, vector<24x128xf32> -> vector<24x128xf32>
    %c0_5 = arith.constant 0 : index
    %c0_6 = arith.constant 0 : index
    %9 = vector.load %arg11[%c0_5, %c0_6] : memref<24x128xf32, #tpu.memory_space<vmem>>, vector<24x128xf32>
    tpu.vector_store %arg11[%c0_5, %c0_6], %8 {strides = array<i32>} : memref<24x128xf32, #tpu.memory_space<vmem>>, vector<24x128xf32>,
    %c0_7 = arith.constant 0 : index
    %c0_8 = arith.constant 0 : index
    %10 = vector.load %arg7[%c0_7, %c0_8] : memref<48x17xf32, #tpu.memory_space<vmem>>, vector<48x17xf32>
    %cst_9 = arith.constant dense<0.000000e+00> : vector<48x144xf32>
    %11 = tpu.matmul %10, %3, %cst_9 {dimension_numbers = #tpu.dot_dimension_numbers<[1], [0], [0], [1], [0, 0, 1, 1], [], []>} : vector<48x17xf32>, vector<17x144xf32>, vector<48x144xf32> -> vector<48x144xf32>
    %12 = vector.extract_strided_slice %11 {offsets = [0, 0], sizes = [24, 144], strides = [1, 1]} : vector<48x144xf32> to vector<24x144xf32>
    %c0_10 = arith.constant 0 : index
    %c0_11 = arith.constant 0 : index
    %13 = vector.load %arg12[%c0_10, %c0_11] : memref<48x144xf32, #tpu.memory_space<vmem>>, vector<24x144xf32>
    tpu.vector_store %arg12[%c0_10, %c0_11], %12 {strides = array<i32>} : memref<48x144xf32, #tpu.memory_space<vmem>>, vector<24x144xf32>,
    %14 = vector.extract_strided_slice %11 {offsets = [24, 0], sizes = [24, 144], strides = [1, 1]} : vector<48x144xf32> to vector<24x144xf32>
    %15 = vector.broadcast %5 : vector<1x144xf32> to vector<24x144xf32>
    %16 = arith.mulf %14, %15 : vector<24x144xf32>
    %c24 = arith.constant 24 : index
    %c0_12 = arith.constant 0 : index
    %17 = vector.load %arg12[%c24, %c0_12] : memref<48x144xf32, #tpu.memory_space<vmem>>, vector<24x144xf32>
    tpu.vector_store %arg12[%c24, %c0_12], %16 {strides = array<i32>} : memref<48x144xf32, #tpu.memory_space<vmem>>, vector<24x144xf32>,
    %c0_13 = arith.constant 0 : index
    %c0_14 = arith.constant 0 : index
    %18 = vector.load %arg5[%c0_13, %c0_14] : memref<128x144xf32, #tpu.memory_space<vmem>>, vector<128x144xf32>
    %cst_15 = arith.constant 0.000000e+00 : f32
    %19 = vector.broadcast %cst_15 : f32 to vector<1x144xf32>
    %20 = arith.cmpf ogt, %5, %19 : vector<1x144xf32>
    %cst_16 = arith.constant 0.000000e+00 : f32
    %cst_17 = arith.constant -13.8155107 : f32
    %21 = vector.broadcast %cst_16 : f32 to vector<1x144xf32>
    %22 = vector.broadcast %cst_17 : f32 to vector<1x144xf32>
    %23 = arith.select %20, %21, %22 : vector<1x144xi1>, vector<1x144xf32>
    %24 = vector.broadcast %23 : vector<1x144xf32> to vector<128x144xf32>
    %25 = arith.addf %18, %24 : vector<128x144xf32>
    %c0_i32 = arith.constant 0 : i32
    %c3_i32 = arith.constant 3 : i32
    %26 = arith.addi %c0_i32, %c3_i32 : i32
    %c1_i32 = arith.constant 1 : i32
    scf.for %arg14 = %c0_i32 to %26 step %c1_i32  : i32 {
      %c8_i32 = arith.constant 8 : i32
      %40 = arith.muli %arg14, %c8_i32 : i32
      %41 = tpu.assume_multiple %40, 8 : i32
      %c8_i32_31 = arith.constant 8 : i32
      %42 = arith.muli %arg14, %c8_i32_31 : i32
      %43 = tpu.assume_multiple %42, 8 : i32
      %c8_i32_32 = arith.constant 8 : i32
      %44 = arith.muli %arg14, %c8_i32_32 : i32
      %c24_i32 = arith.constant 24 : i32
      %45 = arith.addi %c24_i32, %44 : i32
      %46 = tpu.assume_multiple %45, 8 : i32
      %c8_i32_33 = arith.constant 8 : i32
      %47 = arith.muli %arg14, %c8_i32_33 : i32
      %48 = tpu.assume_multiple %47, 8 : i32
      %49 = arith.index_cast %41 : i32 to index
      %c0_34 = arith.constant 0 : index
      %50 = vector.load %arg11[%49, %c0_34] : memref<24x128xf32, #tpu.memory_space<vmem>>, vector<8x128xf32>
      %51 = arith.index_cast %43 : i32 to index
      %c0_35 = arith.constant 0 : index
      %52 = vector.load %arg12[%51, %c0_35] : memref<48x144xf32, #tpu.memory_space<vmem>>, vector<8x144xf32>
      %53 = arith.index_cast %46 : i32 to index
      %c0_36 = arith.constant 0 : index
      %54 = vector.load %arg12[%53, %c0_36] : memref<48x144xf32, #tpu.memory_space<vmem>>, vector<8x144xf32>
      %cst_37 = arith.constant dense<0.000000e+00> : vector<128x144xf32>
      %55 = tpu.matmul %50, %52, %cst_37 {dimension_numbers = #tpu.dot_dimension_numbers<[0], [0], [1], [1], [0, 1, 1, 1], [], []>} : vector<8x128xf32>, vector<8x144xf32>, vector<128x144xf32> -> vector<128x144xf32>
      %56 = arith.addf %55, %25 : vector<128x144xf32>
      %cst_38 = arith.constant dense<0xFF800000> : vector<128xf32>
      %57 = vector.multi_reduction <maximumf>, %56, %cst_38 [1] : vector<128x144xf32> to vector<128xf32>
      %58 = vector.shape_cast %57 : vector<128xf32> to vector<128x1xf32>
      %59 = vector.broadcast %58 : vector<128x1xf32> to vector<128x144xf32>
      %60 = arith.subf %56, %59 : vector<128x144xf32>
      %61 = math.exp %60 : vector<128x144xf32>
      %cst_39 = arith.constant dense<0.000000e+00> : vector<128xf32>
      %62 = vector.multi_reduction <add>, %61, %cst_39 [1] : vector<128x144xf32> to vector<128xf32>
      %63 = vector.shape_cast %62 : vector<128xf32> to vector<128x1xf32>
      %64 = tpu.reciprocal %63 : vector<128x1xf32> -> vector<128x1xf32>
      %65 = vector.broadcast %64 : vector<128x1xf32> to vector<128x144xf32>
      %66 = arith.mulf %61, %65 : vector<128x144xf32>
      %cst_40 = arith.constant dense<0.000000e+00> : vector<8x128xf32>
      %67 = tpu.matmul %54, %66, %cst_40 {dimension_numbers = #tpu.dot_dimension_numbers<[1], [1], [0], [0], [0, 0, 1, 0], [], []>} : vector<8x144xf32>, vector<128x144xf32>, vector<8x128xf32> -> vector<8x128xf32>
      %cst_41 = arith.constant 0.000000e+00 : f32
      %68 = vector.broadcast %cst_41 : f32 to vector<8x128xf32>
      %69 = arith.maximumf %67, %68 : vector<8x128xf32>
      %70 = arith.index_cast %48 : i32 to index
      %c0_42 = arith.constant 0 : index
      %71 = vector.load %arg13[%70, %c0_42] : memref<24x128xf32, #tpu.memory_space<vmem>>, vector<8x128xf32>
      tpu.vector_store %arg13[%70, %c0_42], %69 {strides = array<i32>} : memref<24x128xf32, #tpu.memory_space<vmem>>, vector<8x128xf32>,
    }
    %c3_i32_18 = arith.constant 3 : i32
    %c0_19 = arith.constant 0 : index
    %c0_20 = arith.constant 0 : index
    %27 = vector.load %arg8[%c0_19, %c0_20] : memref<16x24xf32, #tpu.memory_space<vmem>>, vector<16x24xf32>
    %c0_21 = arith.constant 0 : index
    %c0_22 = arith.constant 0 : index
    %28 = vector.load %arg13[%c0_21, %c0_22] : memref<24x128xf32, #tpu.memory_space<vmem>>, vector<24x128xf32>
    %cst_23 = arith.constant dense<0.000000e+00> : vector<16x128xf32>
    %29 = tpu.matmul %27, %28, %cst_23 {dimension_numbers = #tpu.dot_dimension_numbers<[1], [0], [0], [1], [0, 0, 1, 1], [], []>} : vector<16x24xf32>, vector<24x128xf32>, vector<16x128xf32> -> vector<16x128xf32>
    %c0_24 = arith.constant 0 : index
    %c0_25 = arith.constant 0 : index
    %30 = vector.load %arg9[%c0_24, %c0_25] : memref<16x2xf32, #tpu.memory_space<vmem>>, vector<16x1xf32>
    %31 = vector.broadcast %30 : vector<16x1xf32> to vector<16x128xf32>
    %32 = arith.addf %29, %31 : vector<16x128xf32>
    %c0_26 = arith.constant 0 : index
    %c0_27 = arith.constant 0 : index
    %33 = vector.load %arg4[%c0_26, %c0_27] : memref<1x128xf32, #tpu.memory_space<vmem>>, vector<1x128xf32>
    %34 = vector.broadcast %33 : vector<1x128xf32> to vector<16x128xf32>
    %35 = arith.mulf %32, %34 : vector<16x128xf32>
    %c0_28 = arith.constant 0 : index
    %c1 = arith.constant 1 : index
    %36 = vector.load %arg9[%c0_28, %c1] : memref<16x2xf32, #tpu.memory_space<vmem>>, vector<16x1xf32>
    %37 = vector.broadcast %36 : vector<16x1xf32> to vector<16x128xf32>
    %38 = arith.addf %35, %37 : vector<16x128xf32>
    %c0_29 = arith.constant 0 : index
    %c0_30 = arith.constant 0 : index
    %39 = vector.load %arg10[%c0_29, %c0_30] : memref<16x128xf32, #tpu.memory_space<vmem>>, vector<16x128xf32>
    tpu.vector_store %arg10[%c0_29, %c0_30], %38 {strides = array<i32>} : memref<16x128xf32, #tpu.memory_space<vmem>>, vector<16x128xf32>,
    return
  }
  func.func @transform_0(%arg0: i32) -> (i32, i32) {
    %c0_i32 = arith.constant 0 : i32
    %c0_i32_0 = arith.constant 0 : i32
    return %c0_i32, %arg0 : i32, i32
  }
  func.func @transform_1(%arg0: i32) -> (i32, i32) {
    %c0_i32 = arith.constant 0 : i32
    %c0_i32_0 = arith.constant 0 : i32
    %c0_i32_1 = arith.constant 0 : i32
    return %c0_i32, %c0_i32_0 : i32, i32
  }
  func.func @transform_2(%arg0: i32) -> (i32, i32) {
    %c0_i32 = arith.constant 0 : i32
    %c0_i32_0 = arith.constant 0 : i32
    %c0_i32_1 = arith.constant 0 : i32
    return %c0_i32, %c0_i32_0 : i32, i32
  }
  func.func @transform_3(%arg0: i32) -> (i32, i32) {
    %c0_i32 = arith.constant 0 : i32
    %c0_i32_0 = arith.constant 0 : i32
    return %c0_i32, %arg0 : i32, i32
  }
  func.func @transform_4(%arg0: i32) -> (i32, i32) {
    %c0_i32 = arith.constant 0 : i32
    %c0_i32_0 = arith.constant 0 : i32
    %c0_i32_1 = arith.constant 0 : i32
    return %c0_i32, %c0_i32_0 : i32, i32
  }
  func.func @transform_5(%arg0: i32) -> (i32, i32) {
    %c0_i32 = arith.constant 0 : i32
    %c0_i32_0 = arith.constant 0 : i32
    %c0_i32_1 = arith.constant 0 : i32
    return %c0_i32, %c0_i32_0 : i32, i32
  }
  func.func @transform_6(%arg0: i32) -> (i32, i32) {
    %c0_i32 = arith.constant 0 : i32
    %c0_i32_0 = arith.constant 0 : i32
    %c0_i32_1 = arith.constant 0 : i32
    return %c0_i32, %c0_i32_0 : i32, i32
  }
  func.func @transform_7(%arg0: i32) -> (i32, i32) {
    %c0_i32 = arith.constant 0 : i32
    %c0_i32_0 = arith.constant 0 : i32
    %c0_i32_1 = arith.constant 0 : i32
    return %c0_i32, %c0_i32_0 : i32, i32
  }
  func.func @transform_8(%arg0: i32) -> (i32, i32) {
    %c0_i32 = arith.constant 0 : i32
    %c0_i32_0 = arith.constant 0 : i32
    %c0_i32_1 = arith.constant 0 : i32
    return %c0_i32, %c0_i32_0 : i32, i32
  }
  func.func @transform_9(%arg0: i32) -> (i32, i32) {
    %c0_i32 = arith.constant 0 : i32
    %c0_i32_0 = arith.constant 0 : i32
    return %c0_i32, %arg0 : i32, i32
  }
}

</mosaic_0001>

<bundles_post_ra>
// kernel: multi_head_att_layer_forward.1
= control target key start
LH: loop header
LB: loop body
LE: loop exit
PB: predicated region body
PF: predicated region fallthrough
CT: control target
= control target key end

     0   :  { %s1983_s30 = smov 0   ;;  %s1985_s10 = smov 0   ;;  %s2730_s0 = inlined_call_operand.vmem [shape: f32[17,384], index: 0, kind: input, shape index: {}]   ;;  %s2731_s1 = inlined_call_operand.vmem [shape: f32[17,400], index: 1, kind: input, shape index: {}]   ;;  %s2732_s2 = inlined_call_operand.vmem [shape: f32[1,400], index: 2, kind: input, shape index: {}]   ;;  %s2733_s3 = inlined_call_operand.vmem [shape: f32[1,384], index: 3, kind: input, shape index: {}]   ;;  %s2734_s4 = inlined_call_operand.vmem [shape: f32[128,144], index: 4, kind: input, shape index: {}]   ;;  %s2735_s5 = inlined_call_operand.vmem [shape: f32[24,17], index: 5, kind: input, shape index: {}]   ;;  %s2736_s6 = inlined_call_operand.vmem [shape: f32[48,17], index: 6, kind: input, shape index: {}]   ;;  %s2737_s7 = inlined_call_operand.vmem [shape: f32[16,24], index: 7, kind: input, shape index: {}]   ;;  %s2738_s8 = inlined_call_operand.vmem [shape: f32[16,2], index: 8, kind: input, shape index: {}]   ;;  %s2739_s9 = inlined_call_operand.vmem [shape: f32[16,384], index: 9, kind: output, shape index: {}]  }
   0x1   :  { %s1987_s11 = smov 0  }
   0x2 LB: > { %s1999_s12 = sadd.s32 4294967295, %s1921_s11   ;;  %s2002_s13 = sadd.s32 1, %s1921_s11   ;;  %s1921_s11 = sphi %s1987_s11, %s2781_s11   ;;  %s1917_s10 = sphi %s1985_s10, %s2780_s10   ;;  %s1913_s30 = sphi %s1983_s30, %s2779_s30  }
   0x3   : > { %s23_s14 = ssub.s32 %s1921_s11, %s2002_s13  ;;  %s26_s15 = sadd.s32 1, %s1917_s10 }
   0x4   : > { %p24_p0 = scmp.eq.s32.totalorder %s23_s14, 0  ;;  %p33_p1 = scmp.ne.s32.totalorder %s1917_s10, %s1913_s30 }
   0x5   : > { %p34_p2 = scmp.eq.s32.totalorder %s1921_s11, 0  ;;  %p236_p3 = scmp.eq.s32.totalorder %s1999_s12, 2 }
   0x6   : > { %s2012_s16 = scalar_select %p24_p0, %s1917_s10, %s26_s15  }
   0x7   : > { %p35_p4 = por %p34_p2, %p33_p1  ;;  %p2014_p5 = por %p236_p3, %p33_p1 }
   0x8   : > { %p1650_p6 = scmp.ge.s32.totalorder %s1921_s11, 3 }
   0xa   : > { %279 = sbr.rel (%p1650_p6) target bundleno = 21 (0x15), region = 44 }
   0xf   : > { %282 = sbr.rel (!%p35_p4) target bundleno = 21 (0x15), region = 48  ;;  %s284_s18 = sand.u32 (%p35_p4), 1, %s1917_s10  }
  0x10   : > { %s1651_s19 = sshll.u32 (%p35_p4), %s1921_s11, 3  ;;  %s1756_s20 = smul.u32 (%p35_p4), 24, %s284_s18 }
  0x11   : > { %s288_s23 = scalar_lea.vmem (%p35_p4), %s2730_s0, %s1651_s19 }
  0x12   : > { %v321_v0 = vld [vmem:[%s288_s23] sm:$0xff] (%p35_p4)  ;;  %v323_v1 = vld [vmem:[%s288_s23 + $0x18] sm:$0xff] (%p35_p4)  ;;  %v325_v2 = vld [vmem:[%s288_s23 + $0x30] sm:$0xff] (%p35_p4)  ;;  %s286_s24 = scalar_lea.vmem (%p35_p4), [#allocation5], %s1756_s20 }
  0x13   : > { %322 = vst [vmem:[%s286_s24] sm:$0xff] (%p35_p4), %v321_v0  ;;  %324 = vst [vmem:[%s286_s24 + $0x8] sm:$0xff] (%p35_p4), %v323_v1 }
  0x14   : > { %326 = vst [vmem:[%s286_s24 + $0x10] sm:$0xff] %v325_v2 }
  0x15 PF: > { %p1652_p7 = scmp.ge.s32.totalorder %s1921_s11, 1  ;;  %p337_p8 = scmp.lt.s32.totalorder %s1921_s11, 4 }
  0x17   : > { %p338_p9 = pnand %p1652_p7, %p337_p8 }
  0x19   : > { %341 = sbr.rel (%p338_p9) target bundleno = 1440 (0x5a0), region = 90 }
  0x1e   : > { %s1654_s25 = sshll.u32 %s1999_s12, 7  ;;  %p381_p10 = scmp.lt.s32.totalorder %s1999_s12, 2  ;;  %v1927_v3 = vmov 0.0   ;;  %vm413_vm0 = vcmask 1040384   ;;  %vm1928_vm1 = vmmov 0   ;;  %vm403_vm2 = vcmask 138240  }
  0x1f   : > { %s2028_s26 = sshra.s32 %s1654_s25, 7  ;;  %1726 = vmatprep.subr.mxu0 %v1927_v3  ;;  %s344_s27 = sand.u32 1, %s1913_s30   ;;  %600 = vmatprep.mubr.f32.mxu1 %v1927_v3  ;;  %v501_v12 = vld [vmem:[%s2736_s6 + $0x8] sm:$0xff]  ;;  %v397_v14 = vld [vmem:[%s2735_s5] sm:$0xff]  ;;  %v502_v15 = vld [vmem:[%s2736_s6 + $0x10] sm:$0xff]  ;;  %v639_v22 = vlaneseq  ;;  %vm632_vm4 = vcmask 130048  }
  0x20   : > { %s1655_s28 = sshll.u32 %s2028_s26, 3  ;;  %s1757_s29 = smul.u32 24, %s344_s27  ;;  %1732 = vmatprep.mubr.msk.f32.mxu0 %vm1928_vm1, %v1927_v3  ;;  %v398_v16 = vld [vmem:[%s2735_s5 + $0x8] sm:$0xff]  ;;  %v503_v17 = vld [vmem:[%s2736_s6 + $0x18] sm:$0xff]  ;;  %v399_v18 = vld [vmem:[%s2735_s5 + $0x10] sm:$0xff] }
  0x21   : > { %s388_s15 = scalar_lea.vmem %s2731_s1, %s1655_s28  ;;  %s2036_s18 = sshll.u32 %s344_s27, 4  ;;  %v504_v19 = vld [vmem:[%s2736_s6 + $0x20] sm:$0xff]  ;;  %v505_v21 = vld [vmem:[%s2736_s6 + $0x28] sm:$0xff]  ;;  %v2090_v23 = vshrl.u32 %v639_v22, 7  ;;  %v663_v27 = vld [vmem:[%s2734_s4 + $0x10] sm:$0xff] }
  0x22   : > { %v394_v4 = vld [vmem:[%s388_s15 + $0x48] sm:$0x1]  ;;  %v393_v5 = vld [vmem:[%s388_s15 + $0x40] sm:$0x1]  ;;  %s2041_s19 = scalar_select %p381_p10, %s1999_s12, 2  ;;  %v667_v29 = vld [vmem:[%s2734_s4 + $0x30] sm:$0xff] }
  0x23   : > { %v392_v6 = vld [vmem:[%s388_s15 + $0x28] sm:$0xff]  ;;  %1750 = vmatprep.subr.msk.mxu1 %vm413_vm0, %v394_v4  ;;  %v391_v7 = vld [vmem:[%s388_s15 + $0x20] sm:$0xff]  ;;  %s346_s22 = scalar_lea.vmem [#allocation5], %s1757_s29  ;;  %v641_v25 = vsub.s32 0, %v2090_v23  ;;  %v671_v31 = vld [vmem:[%s2734_s4 + $0x50] sm:$0xff]  ;;  %v645_v34 = vsub.s32 1, %v2090_v23 }
  0x24   : > { %1753 = vmatpush1.msk.msra.mxu1 %vm413_vm0, %v393_v5  ;;  %s383_s21 = scalar_lea.vmem %s2733_s3, %s2041_s19  ;;  %v390_v8 = vld [vmem:[%s388_s15 + $0x8] sm:$0xff]  ;;  %v402_v9 = vld [vmem:[%s346_s22 + $0x10] sm:$0x1]  ;;  %v401_v10 = vld [vmem:[%s346_s22 + $0x8] sm:$0xff]  ;;  %v1929_v32 = vmov -13.815511  }
  0x25   : > { %1751 = vmatprep.subr.mxu1 %v392_v6  ;;  %1727 = vmatpush3.msk.msra.mxu0 %vm413_vm0, %v402_v9  ;;  %v389_v11 = vld [vmem:[%s388_s15] sm:$0xff]  ;;  %v400_v13 = vld [vmem:[%s346_s22] sm:$0xff]  ;;  %s395_s15 = scalar_lea.vmem %s2732_s2, %s2028_s26  ;;  %v664_v56 = vld [vmem:[%s2734_s4 + $0x18] sm:$0xff]  ;;  %s2280_s30 = smov 0  }
  0x26   : > { %1754 = vmatpush1.msra.mxu1 %v391_v7  ;;  %1728 = vmatprep.subr.mxu0 %v1927_v3  ;;  %v500_v20 = vld [vmem:[%s2736_s6] sm:$0xff]  ;;  %v675_v36 = vld [vmem:[%s2734_s4 + $0x70] sm:$0xff]  ;;  %v662_v55 = vld [vmem:[%s2734_s4 + $0x8] sm:$0xff] }
  0x27   : > { %1752 = vmatprep.subr.mxu1 %v390_v8  ;;  %1729 = vmatpush3.msra.mxu0 %v401_v10  ;;  %v2096_v24 = vld [vmem:[%s395_s15] sm:$0x3]  ;;  %v679_v39 = vld [vmem:[%s2734_s4 + $0x90] sm:$0xff]  ;;  %v666_v61 = vld [vmem:[%s2734_s4 + $0x28] sm:$0xff]  ;;  %s2278_s15 = scalar_lea.vmem [#allocation6], %s2036_s18 }
  0x28   : > { %1755 = vmatpush1.msra.mxu1 %v389_v11  ;;  %1730 = vmatprep.subr.mxu0 %v1927_v3  ;;  %v661_v26 = vld [vmem:[%s2734_s4] sm:$0xff]  ;;  %vm693_vm3 = vcmp.gt.f32.partialorder %v2096_v24, 0.0  ;;  %v683_v41 = vld [vmem:[%s2734_s4 + $0xb0] sm:$0xff]  ;;  %v668_v62 = vld [vmem:[%s2734_s4 + $0x38] sm:$0xff] }
  0x29   : > { %1663 = vmatmul.mubr.msk.f32.vlgmr.msra.gmra.mxu1 %vm403_vm2, %v501_v12  ;;  %1731 = vmatpush3.msra.mxu0 %v400_v13  ;;  %v665_v28 = vld [vmem:[%s2734_s4 + $0x20] sm:$0xff]  ;;  %v694_v33 = vsel %vm693_vm3, 0.0, %v1929_v32  ;;  %v687_v44 = vld [vmem:[%s2734_s4 + $0xd0] sm:$0xff]  ;;  %v670_v63 = vld [vmem:[%s2734_s4 + $0x48] sm:$0xff] }
  0x2a   : > { %606 = vmatprep.mubr.f32.mxu1 %v1927_v3  ;;  %1733 = vmatmul.mubr.msk.f32.vlgmr.msra.gmra.mxu0 %vm403_vm2, %v397_v14  ;;  %v669_v30 = vld [vmem:[%s2734_s4 + $0x40] sm:$0xff]  ;;  %v699_v38 = vrot.slane %v694_v33, %v641_v25  ;;  %v703_v42 = vrot.slane %v694_v33, %v645_v34  ;;  %v691_v50 = vld [vmem:[%s2734_s4 + $0xf0] sm:$0xff]  ;;  %v682_v9 = vld [vmem:[%s2734_s4 + $0xa8] sm:$0xff] }
  0x2b   : > { %1660 = vmatprep.subr.msk.mxu0 %vm413_vm0, %v394_v4  ;;  %1735 = vmatprep.mubr.msk.f32.mxu0 %vm1928_vm1, %v1927_v3  ;;  %v673_v35 = vld [vmem:[%s2734_s4 + $0x60] sm:$0xff]  ;;  %v672_v4 = vld [vmem:[%s2734_s4 + $0x58] sm:$0xff] }
  0x2c   : > { %1661 = vmatpush1.msk.msra.mxu0 %vm413_vm0, %v393_v5  ;;  %v677_v37 = vld [vmem:[%s2734_s4 + $0x80] sm:$0xff]  ;;  %v2150_v46 = vadd.f32 %v699_v38, %v661_v26  ;;  %v2152_v47 = vadd.f32 %v699_v38, %v663_v27  ;;  %v2154_v48 = vadd.f32 %v699_v38, %v665_v28  ;;  %v2156_v49 = vadd.f32 %v699_v38, %v667_v29  ;;  %v674_v5 = vld [vmem:[%s2734_s4 + $0x68] sm:$0xff]  ;;  %v684_v14 = vld [vmem:[%s2734_s4 + $0xb8] sm:$0xff] }
  0x2d   : > { %1664 = vmatmul.mubr.msk.f32.gmra.mxu1 %vm403_vm2, %v502_v15  ;;  %558 = vmatprep.subr.mxu0 %v392_v6  ;;  %v681_v40 = vld [vmem:[%s2734_s4 + $0xa0] sm:$0xff]  ;;  %v2161_v51 = vadd.f32 %v699_v38, %v669_v30  ;;  %v2163_v52 = vadd.f32 %v699_v38, %v671_v31  ;;  %v2165_v53 = vadd.f32 %v699_v38, %v673_v35  ;;  %v676_v6 = vld [vmem:[%s2734_s4 + $0x78] sm:$0xff]  ;;  %v686_v15 = vld [vmem:[%s2734_s4 + $0xc8] sm:$0xff] }
  0x2e   : > { %612 = vmatprep.mubr.f32.mxu1 %v1927_v3  ;;  %1736 = vmatmul.mubr.msk.f32.gmra.mxu0 %vm403_vm2, %v398_v16  ;;  %v685_v43 = vld [vmem:[%s2734_s4 + $0xc0] sm:$0xff]  ;;  %2741 = vst [vmem:[#allocation7_spill] sm:$0xff] %v2150_v46  ;;  %2742 = vst [vmem:[#allocation8_spill] sm:$0xff] %v2152_v47  ;;  %v2167_v54 = vadd.f32 %v699_v38, %v675_v36  ;;  %v2175_v57 = vadd.f32 %v699_v38, %v677_v37  ;;  %v688_v16 = vld [vmem:[%s2734_s4 + $0xd8] sm:$0xff] }
  0x2f   : > { %559 = vmatpush1.msra.mxu0 %v391_v7  ;;  %1738 = vmatprep.mubr.msk.f32.mxu0 %vm1928_vm1, %v1927_v3  ;;  %v689_v45 = vld [vmem:[%s2734_s4 + $0xe0] sm:$0xff]  ;;  %v2177_v58 = vadd.f32 %v699_v38, %v679_v39  ;;  %v2179_v59 = vadd.f32 %v699_v38, %v681_v40  ;;  %v2181_v60 = vadd.f32 %v699_v38, %v683_v41  ;;  %v678_v7 = vld [vmem:[%s2734_s4 + $0x88] sm:$0xff]  ;;  %v692_v22 = vld [vmem:[%s2734_s4 + $0xf8] sm:$0xff] }
  0x30   : > { %560 = vmatprep.subr.mxu0 %v390_v8  ;;  %v2192_v0 = vadd.f32 %v699_v38, %v685_v43  ;;  %v2194_v1 = vadd.f32 %v699_v38, %v687_v44  ;;  %v2196_v2 = vadd.f32 %v699_v38, %v689_v45  ;;  %v680_v8 = vld [vmem:[%s2734_s4 + $0x98] sm:$0xff]  ;;  %v2218_v10 = vadd.f32 %v703_v42, %v662_v55 }
  0x31   : > { %1665 = vmatmul.mubr.msk.f32.gmra.mxu1 %vm403_vm2, %v503_v17  ;;  %561 = vmatpush1.msra.mxu0 %v389_v11  ;;  %v2220_v11 = vadd.f32 %v703_v42, %v664_v56  ;;  %v2222_v12 = vadd.f32 %v703_v42, %v666_v61  ;;  %v2224_v13 = vadd.f32 %v703_v42, %v668_v62 }
  0x32   : > { %618 = vmatprep.mubr.f32.mxu1 %v1927_v3  ;;  %1739 = vmatmul.mubr.msk.f32.gmra.mxu0 %vm403_vm2, %v399_v18  ;;  %2743 = vst [vmem:[#allocation9_spill] sm:$0xff] %v2192_v0  ;;  %2744 = vst [vmem:[#allocation10_spill] sm:$0xff] %v2194_v1  ;;  %v2235_v17 = vadd.f32 %v703_v42, %v670_v63  ;;  %v2237_v18 = vadd.f32 %v703_v42, %v672_v4 }
  0x33   : > { %594 = vmatprep.mubr.f32.mxu0 %v1927_v3  ;;  %2745 = vst [vmem:[#allocation11_spill] sm:$0xff] %v2196_v2  ;;  %2747 = vst [vmem:[#allocation13_spill] sm:$0xff] %v2218_v10  ;;  %v2249_v26 = vadd.f32 %v703_v42, %v678_v7  ;;  %v2251_v27 = vadd.f32 %v703_v42, %v680_v8  ;;  %v2253_v28 = vadd.f32 %v703_v42, %v682_v9 }
  0x34   : > { %2748 = vst [vmem:[#allocation14_spill] sm:$0xff] %v2220_v11  ;;  %2749 = vst [vmem:[#allocation15_spill] sm:$0xff] %v2222_v12  ;;  %v2255_v29 = vadd.f32 %v703_v42, %v684_v14  ;;  %v2257_v30 = vadd.f32 %v703_v42, %v686_v15  ;;  %v2259_v31 = vadd.f32 %v703_v42, %v688_v16 }
  0x35   : > { %1666 = vmatmul.mubr.msk.f32.gmra.mxu1 %vm403_vm2, %v504_v19  ;;  %2750 = vst [vmem:[#allocation16_spill] sm:$0xff] %v2224_v13  ;;  %2751 = vst [vmem:[#allocation17_spill] sm:$0xff] %v2235_v17  ;;  %v2239_v19 = vadd.f32 %v703_v42, %v674_v5  ;;  %v2263_v33 = vadd.f32 %v703_v42, %v692_v22  ;;  %v642_v41 = vrot.slane %v2096_v24, %v641_v25 }
  0x36   : > { %624 = vmatprep.mubr.f32.mxu1 %v1927_v3  ;;  %1662 = vmatmul.mubr.msk.f32.vlgmr.msra.gmra.mxu0 %vm403_vm2, %v500_v20  ;;  %v2198_v3 = vadd.f32 %v699_v38, %v691_v50  ;;  %2752 = vst [vmem:[#allocation18_spill] sm:$0xff] %v2237_v18  ;;  %v2241_v20 = vadd.f32 %v703_v42, %v676_v6  ;;  %2755 = vst [vmem:[#allocation21_spill] sm:$0xff] %v2257_v30 }
  0x37   : > { %2753 = vst [vmem:[#allocation19_spill] sm:$0xff] %v2239_v19  ;;  %v646_v44 = vrot.slane %v2096_v24, %v645_v34 }
  0x38   : > { %2746 = vst [vmem:[#allocation12_spill] sm:$0xff] %v2198_v3  ;;  %2754 = vst [vmem:[#allocation20_spill] sm:$0xff] %v2241_v20 }
  0x39   : > { %1667 = vmatmul.mubr.msk.f32.gmra.mxu1 %vm403_vm2, %v505_v21  ;;  %v690_v21 = vld [vmem:[%s2734_s4 + $0xe8] sm:$0xff] }
  0x3a   : > { %v2261_v32 = vadd.f32 %v703_v42, %v690_v21 }
  0xe9   : > { %v602_v35 = vpop.f32.mrf.mxu1 }
  0xea   : > { %634 = vst [vmem:[#allocation3 + $0x10] sm:$0xff] %v602_v35  ;;  %v483_v36 = vpop.f32.mrf.mxu0 }
  0xeb   : > { %v604_v37 = vpop.f32.mrf.mxu1  ;;  %497 = vst [vmem:[#allocation2] sm:$0xff] %v483_v36 }
  0xec   : > { %635 = vst.msk [vmem:[#allocation3 + $0x18] sm:$0xff] %vm632_vm4, %v604_v37  ;;  %v1734_v38 = vpop.f32.mrf.mxu0 }
  0xed   : > { %v608_v39 = vpop.f32.mrf.mxu1 }
  0xee   : > { %636 = vst [vmem:[#allocation3 + $0x20] sm:$0xff] %v608_v39  ;;  %v488_v40 = vpop.f32.mrf.mxu0 }
  0xef   : > { %v610_v43 = vpop.f32.mrf.mxu1  ;;  %498 = vst [vmem:[#allocation2 + $0x8] sm:$0xff] %v488_v40 }
  0xf0   : > { %637 = vst.msk [vmem:[#allocation3 + $0x28] sm:$0xff] %vm632_vm4, %v610_v43  ;;  %v1737_v42 = vpop.f32.mrf.mxu0 }
  0xf1   : > { %v614_v45 = vpop.f32.mrf.mxu1 }
  0xf2   : > { %v649_v50 = vmul.f32 %v642_v41, %v614_v45  ;;  %v493_v55 = vpop.f32.mrf.mxu0 }
  0xf3   : > { %v616_v56 = vpop.f32.mrf.mxu1  ;;  %499 = vst [vmem:[#allocation2 + $0x10] sm:$0xff] %v493_v55 }
  0xf4   : > { %655 = vst [vmem:[#allocation3 + $0x30] sm:$0xff] %v649_v50  ;;  %v650_v61 = vmul.f32 %v646_v44, %v616_v56  ;;  %v1740_v62 = vpop.f32.mrf.mxu0 }
  0xf5   : > { %v620_v63 = vpop.f32.mrf.mxu1 }
  0xf6   : > { %656 = vst.msk [vmem:[#allocation3 + $0x38] sm:$0xff] %vm632_vm4, %v650_v61  ;;  %v651_v25 = vmul.f32 %v642_v41, %v620_v63  ;;  %v596_v4 = vpop.f32.mrf.mxu0 }
  0xf7   : > { %v622_v5 = vpop.f32.mrf.mxu1  ;;  %631 = vst [vmem:[#allocation3] sm:$0xff] %v596_v4 }
  0xf8   : > { %657 = vst [vmem:[#allocation3 + $0x40] sm:$0xff] %v651_v25  ;;  %v652_v23 = vmul.f32 %v646_v44, %v622_v5  ;;  %v598_v6 = vpop.f32.mrf.mxu0 }
  0xf9   : > { %v626_v24 = vpop.f32.mrf.mxu1  ;;  %633 = vst.msk [vmem:[#allocation3 + $0x8] sm:$0xff] %vm632_vm4, %v598_v6 }
  0xfa   : > { %658 = vst.msk [vmem:[#allocation3 + $0x48] sm:$0xff] %vm632_vm4, %v652_v23  ;;  %v653_v34 = vmul.f32 %v642_v41, %v626_v24 }
  0xfb   : > { %v628_v7 = vpop.f32.mrf.mxu1 }
  0xfc   : > { %659 = vst [vmem:[#allocation3 + $0x50] sm:$0xff] %v653_v34  ;;  %v654_v8 = vmul.f32 %v646_v44, %v628_v7 }
  0xfe   : > { %660 = vst.msk [vmem:[#allocation3 + $0x58] sm:$0xff] %vm632_vm4, %v654_v8 }
  0xff LB: >> { %v1930_v9 = vmov 0.0   ;;  %s2286_s20 = sshll.u32 %s1925_s30, 3  ;;  %vm794_vm5 = vcmask 64512   ;;  %v2760_v2 = vld [vmem:[#allocation11_spill] sm:$0xff]  ;;  %v2761_v30 = vld [vmem:[#allocation21_spill] sm:$0xff]  ;;  %v2762_v1 = vld [vmem:[#allocation10_spill] sm:$0xff]  ;;  %s1925_s30 = sphi %s2280_s30, %s743_s30  }
 0x100   : >> { %907 = vmatprep.mubr.f32.mxu0 %v1930_v9  ;;  %s748_s22 = sshra.s32 %s2286_s20, 3  ;;  %s746_s23 = scalar_lea.vmem [#allocation2], %s2286_s20  ;;  %v2763_v3 = vld [vmem:[#allocation12_spill] sm:$0xff]  ;;  %v2764_v0 = vld [vmem:[#allocation9_spill] sm:$0xff]  ;;  %v2766_v19 = vld [vmem:[#allocation19_spill] sm:$0xff] }
 0x101   : >> { %v747_v14 = vld [vmem:[%s746_s23] sm:$0xff]  ;;  %s1713_s24 = sshll.u32 %s748_s22, 4  ;;  %v2765_v20 = vld [vmem:[#allocation20_spill] sm:$0xff]  ;;  %v2767_v18 = vld [vmem:[#allocation18_spill] sm:$0xff]  ;;  %s745_s25 = sadd.s32 24, %s2286_s20 }
 0x102   : >> { %762 = vxpose.xlu0.b32.start.end [1/1] (short) %v747_v14, 128  ;;  %s752_s18 = scalar_lea.vmem [#allocation3], %s1713_s24  ;;  %v2768_v17 = vld [vmem:[#allocation17_spill] sm:$0xff]  ;;  %v2769_v13 = vld [vmem:[#allocation16_spill] sm:$0xff]  ;;  %v2770_v12 = vld [vmem:[#allocation15_spill] sm:$0xff]  ;;  %s755_s27 = sshra.s32 %s745_s25, 3 }
 0x103   : >> { %v2771_v11 = vld [vmem:[#allocation14_spill] sm:$0xff]  ;;  %s1714_s26 = sshll.u32 %s755_s27, 4  ;;  %s1398_s29 = scalar_lea.vmem [#allocation4], %s2286_s20 }
 0x104   : >> { %s2634_s28 = scalar_lea.vmem [#allocation3], %s1714_s26  ;;  %s743_s30 = sadd.s32 1, %s1925_s30  }
 0x105   : >> { %v754_v15 = vld [vmem:[%s752_s18 + $0x8] sm:$0xff]  ;;  %v753_v16 = vld [vmem:[%s752_s18] sm:$0xff]  ;;  %p740_p11 = scmp.ge.s32.totalorder %s743_s30, 3  }
 0x106   : >> { %873 = vmatprep.subr.mxu0 %v754_v15  ;;  %vm1417_vm6 = vcmask (%p740_p11), 195584  }
 0x107   : >> { %874 = vmatpush1.msra.mxu0 %v753_v16 }
 0x17e   : >> { %v778_v21 = vpop.trf.xlu0 }
 0x17f   : >> { %1673 = vmatmul.mubr.msk.f32.vlgmr.msra.gmra.mxu0 %vm794_vm5, %v778_v21 }
 0x180   : >> { %913 = vmatprep.mubr.f32.mxu0 %v1930_v9 }
 0x182   : >> { %v779_v22 = vpop.trf.xlu0 }
 0x183   : >> { %1674 = vmatmul.mubr.msk.f32.gmra.mxu0 %vm794_vm5, %v779_v22 }
 0x184   : >> { %919 = vmatprep.mubr.f32.mxu0 %v1930_v9 }
 0x186   : >> { %v780_v35 = vpop.trf.xlu0 }
 0x187   : >> { %1675 = vmatmul.mubr.msk.f32.gmra.mxu0 %vm794_vm5, %v780_v35 }
 0x188   : >> { %925 = vmatprep.mubr.f32.mxu0 %v1930_v9 }
 0x18a   : >> { %v781_v36 = vpop.trf.xlu0 }
 0x18b   : >> { %1676 = vmatmul.mubr.msk.f32.gmra.mxu0 %vm794_vm5, %v781_v36 }
 0x18c   : >> { %931 = vmatprep.mubr.f32.mxu0 %v1930_v9 }
 0x18e   : >> { %v782_v37 = vpop.trf.xlu0 }
 0x18f   : >> { %1677 = vmatmul.mubr.msk.f32.gmra.mxu0 %vm794_vm5, %v782_v37 }
 0x190   : >> { %937 = vmatprep.mubr.f32.mxu0 %v1930_v9 }
 0x192   : >> { %v783_v38 = vpop.trf.xlu0 }
 0x193   : >> { %1678 = vmatmul.mubr.msk.f32.gmra.mxu0 %vm794_vm5, %v783_v38 }
 0x194   : >> { %943 = vmatprep.mubr.f32.mxu0 %v1930_v9 }
 0x196   : >> { %v784_v39 = vpop.trf.xlu0 }
 0x197   : >> { %1679 = vmatmul.mubr.msk.f32.gmra.mxu0 %vm794_vm5, %v784_v39 }
 0x198   : >> { %949 = vmatprep.mubr.f32.mxu0 %v1930_v9 }
 0x19a   : >> { %v785_v40 = vpop.trf.xlu0 }
 0x19b   : >> { %1680 = vmatmul.mubr.msk.f32.gmra.mxu0 %vm794_vm5, %v785_v40 }
 0x19c   : >> { %955 = vmatprep.mubr.f32.mxu0 %v1930_v9 }
 0x19e   : >> { %v786_v41 = vpop.trf.xlu0 }
 0x19f   : >> { %1681 = vmatmul.mubr.msk.f32.gmra.mxu0 %vm794_vm5, %v786_v41 }
 0x1a0   : >> { %961 = vmatprep.mubr.f32.mxu0 %v1930_v9 }
 0x1a2   : >> { %v787_v43 = vpop.trf.xlu0 }
 0x1a3   : >> { %1682 = vmatmul.mubr.msk.f32.gmra.mxu0 %vm794_vm5, %v787_v43 }
 0x1a4   : >> { %967 = vmatprep.mubr.f32.mxu0 %v1930_v9 }
 0x1a6   : >> { %v788_v42 = vpop.trf.xlu0 }
 0x1a7   : >> { %1683 = vmatmul.mubr.msk.f32.gmra.mxu0 %vm794_vm5, %v788_v42 }
 0x1a8   : >> { %973 = vmatprep.mubr.f32.mxu0 %v1930_v9 }
 0x1aa   : >> { %v789_v44 = vpop.trf.xlu0 }
 0x1ab   : >> { %1684 = vmatmul.mubr.msk.f32.gmra.mxu0 %vm794_vm5, %v789_v44 }
 0x1ac   : >> { %979 = vmatprep.mubr.f32.mxu0 %v1930_v9 }
 0x1ae   : >> { %v790_v45 = vpop.trf.xlu0 }
 0x1af   : >> { %1685 = vmatmul.mubr.msk.f32.gmra.mxu0 %vm794_vm5, %v790_v45 }
 0x1b0   : >> { %985 = vmatprep.mubr.f32.mxu0 %v1930_v9 }
 0x1b2   : >> { %v791_v50 = vpop.trf.xlu0 }
 0x1b3   : >> { %1686 = vmatmul.mubr.msk.f32.gmra.mxu0 %vm794_vm5, %v791_v50 }
 0x1b4   : >> { %991 = vmatprep.mubr.f32.mxu0 %v1930_v9 }
 0x1b6   : >> { %v792_v55 = vpop.trf.xlu0 }
 0x1b7   : >> { %1687 = vmatmul.mubr.msk.f32.gmra.mxu0 %vm794_vm5, %v792_v55 }
 0x1b8   : >> { %997 = vmatprep.mubr.f32.mxu0 %v1930_v9 }
 0x1ba   : >> { %v793_v56 = vpop.trf.xlu0 }
 0x1bb   : >> { %1688 = vmatmul.mubr.msk.f32.gmra.mxu0 %vm794_vm5, %v793_v56 }
 0x23f   : >> { %v2306_v61 = vpop.f32.mrf.mxu0 }
 0x240   : >> { %2756 = vst [vmem:[#allocation22_spill] sm:$0xff] %v2306_v61 }
 0x241   : >> { %v2308_v62 = vpop.f32.mrf.mxu0 }
 0x242   : >> { %2757 = vst [vmem:[#allocation23_spill] sm:$0xff] %v2308_v62 }
 0x243   : >> { %v2310_v63 = vpop.f32.mrf.mxu0 }
 0x244   : >> { %2758 = vst [vmem:[#allocation24_spill] sm:$0xff] %v2310_v63 }
 0x245   : >> { %v2312_v25 = vpop.f32.mrf.mxu0 }
 0x247   : >> { %v2314_v4 = vpop.f32.mrf.mxu0 }
 0x248   : >> { %2759 = vst [vmem:[#allocation25_spill] sm:$0xff] %v2314_v4 }
 0x249   : >> { %v2316_v5 = vpop.f32.mrf.mxu0 }
 0x24b   : >> { %v2318_v23 = vpop.f32.mrf.mxu0 }
 0x24d   : >> { %v2320_v6 = vpop.f32.mrf.mxu0 }
 0x24f   : >> { %v2322_v24 = vpop.f32.mrf.mxu0 }
 0x251   : >> { %v2324_v34 = vpop.f32.mrf.mxu0 }
 0x253   : >> { %v2326_v7 = vpop.f32.mrf.mxu0 }
 0x255   : >> { %v2328_v8 = vpop.f32.mrf.mxu0 }
 0x257   : >> { %v2330_v9 = vpop.f32.mrf.mxu0 }
 0x259   : >> { %v947_v14 = vpop.f32.mrf.mxu0 }
 0x25b   : >> { %v951_v15 = vpop.f32.mrf.mxu0 }
 0x25d   : >> { %v953_v16 = vpop.f32.mrf.mxu0 }
 0x25f   : >> { %v957_v21 = vpop.f32.mrf.mxu0 }
 0x261   : >> { %v959_v22 = vpop.f32.mrf.mxu0 }
 0x263   : >> { %v963_v35 = vpop.f32.mrf.mxu0 }
 0x265   : >> { %v965_v36 = vpop.f32.mrf.mxu0 }
 0x267   : >> { %v969_v37 = vpop.f32.mrf.mxu0 }
 0x269   : >> { %v971_v38 = vpop.f32.mrf.mxu0 }
 0x26b   : >> { %v975_v39 = vpop.f32.mrf.mxu0 }
 0x26d   : >> { %v977_v40 = vpop.f32.mrf.mxu0 }
 0x26f   : >> { %v981_v41 = vpop.f32.mrf.mxu0 }
 0x271   : >> { %v983_v43 = vpop.f32.mrf.mxu0 }
 0x272   : >> { %v2345_v10 = vadd.f32 %v983_v43, %v2761_v30 }
 0x273   : >> { %v987_v42 = vpop.f32.mrf.mxu0 }
 0x274   : >> { %v1052_v30 = vsel %vm632_vm4, %v2345_v10, -inf }
 0x275   : >> { %v989_v44 = vpop.f32.mrf.mxu0 }
 0x276   : >> { %v2333_v55 = vadd.f32 %v989_v44, %v2259_v31 }
 0x277   : >> { %v993_v45 = vpop.f32.mrf.mxu0 }
 0x278   : >> { %v2339_v61 = vadd.f32 %v993_v45, %v2760_v2  ;;  %v1056_v44 = vsel %vm632_vm4, %v2333_v55, -inf }
 0x279   : >> { %v995_v50 = vpop.f32.mrf.mxu0 }
 0x27a   : >> { %v2336_v56 = vadd.f32 %v995_v50, %v2261_v32  ;;  %v2353_v50 = vadd.f32 %v987_v42, %v2762_v1  ;;  %v2368_v42 = vadd.f32 %v981_v41, %v2764_v0  ;;  %v2381_v1 = vadd.f32 %v965_v36, %v2251_v27 }
 0x27b   : >> { %v999_v46 = vpop.f32.mrf.mxu0 }
 0x27c   : >> { %v1060_v63 = vsel %vm632_vm4, %v2336_v56, -inf  ;;  %v2356_v45 = vadd.f32 %v999_v46, %v2763_v3  ;;  %v1053_v46 = vmax.f32 %v2368_v42, %v1052_v30  ;;  %v2386_v30 = vadd.f32 %v969_v37, %v2179_v59 }
 0x27d   : >> { %v1001_v47 = vpop.f32.mrf.mxu0  ;;  %v1061_v62 = vmax.f32 %v2339_v61, %v1060_v63  ;;  %v1057_v63 = vmax.f32 %v2353_v50, %v1056_v44 }
 0x27e   : >> { %v2348_v4 = vadd.f32 %v1001_v47, %v2263_v33  ;;  %v2363_v47 = vadd.f32 %v977_v40, %v2255_v29 }
 0x27f   : >> { %1062 = vmax.xlane.f32.xlu1 %v1061_v62  ;;  %v2372_v62 = vadd.f32 %v971_v38, %v2253_v28 }
 0x280   : >> { %v1064_v2 = vsel %vm632_vm4, %v2348_v4, -inf  ;;  %v1048_v44 = vsel %vm632_vm4, %v2363_v47, -inf }
 0x281   : >> { %v1065_v43 = vmax.f32 %v2356_v45, %v1064_v2  ;;  %v2377_v2 = vadd.f32 %v975_v39, %v2181_v60  ;;  %v1044_v41 = vsel %vm632_vm4, %v2372_v62, -inf  ;;  %v1040_v39 = vsel %vm632_vm4, %v2381_v1, -inf }
 0x282   : >> { %v1045_v38 = vmax.f32 %v2386_v30, %v1044_v41  ;;  %v2413_v41 = vadd.f32 %v951_v15, %v2167_v54  ;;  %v2429_v15 = vadd.f32 %v2324_v34, %v2768_v17  ;;  %v2446_v34 = vadd.f32 %v2322_v24, %v2161_v51  ;;  %v1406_v51 = vld [vmem:[%s2738_s8 + $0x8] sm:$0xff] (%p740_p11) }
 0x283   : >> { %1058 = vmax.xlane.f32.xlu1 %v1057_v63  ;;  %1066 = vmax.xlane.f32.xlu0 %v1065_v43  ;;  %v1049_v40 = vmax.f32 %v2377_v2, %v1048_v44  ;;  %v2390_v63 = vadd.f32 %v959_v22, %v2249_v26  ;;  %v2395_v43 = vadd.f32 %v963_v35, %v2177_v58  ;;  %v1708_v58 = vld [vmem:[%s383_s21] ss:$0 sm:$0xff] (%p740_p11) }
 0x284   : >> { %v2404_v44 = vadd.f32 %v957_v21, %v2175_v57  ;;  %v2462_v24 = vadd.f32 %v2312_v25, %v2771_v11  ;;  %v2776_v25 = vld [vmem:[#allocation24_spill] sm:$0xff] }
 0x285   : >> { %v1041_v36 = vmax.f32 %v2395_v43, %v1040_v39  ;;  %v1036_v37 = vsel %vm632_vm4, %v2390_v63, -inf }
 0x286   : >> { %v1037_v22 = vmax.f32 %v2404_v44, %v1036_v37 }
 0x287   : >> { %1054 = vmax.xlane.f32.xlu1 %v1053_v46  ;;  %v2399_v46 = vadd.f32 %v953_v16, %v2765_v20 }
 0x289   : >> { %v1032_v35 = vsel %vm632_vm4, %v2399_v46, -inf }
 0x28a   : >> { %v1033_v16 = vmax.f32 %v2413_v41, %v1032_v35 }
 0x28b   : >> { %1050 = vmax.xlane.f32.xlu1 %v1049_v40  ;;  %v2408_v40 = vadd.f32 %v947_v14, %v2766_v19  ;;  %v2424_v14 = vadd.f32 %v2330_v9, %v2165_v53  ;;  %v2440_v9 = vadd.f32 %v2320_v6, %v2769_v13  ;;  %v2457_v6 = vadd.f32 %v2318_v23, %v2156_v49  ;;  %v2774_v23 = vld [vmem:[#allocation23_spill] sm:$0xff] }
 0x28c   : > { %v1932_v49 = vmov (%p740_p11), 1  }
 0x28d   : >> { %v1028_v21 = vsel %vm632_vm4, %v2408_v40, -inf  ;;  %1893 = vset.pattern.permute.xlu1 (%p740_p11), %v1932_v49 }
 0x28e   : >> { %v1029_v39 = vmax.f32 %v2424_v14, %v1028_v21 }
 0x28f   : >> { %1046 = vmax.xlane.f32.xlu1 %v1045_v38  ;;  %v2418_v38 = vadd.f32 %v2328_v8, %v2767_v18  ;;  %v2435_v8 = vadd.f32 %v2326_v7, %v2163_v52  ;;  %v2451_v7 = vadd.f32 %v2316_v5, %v2770_v12  ;;  %v2772_v5 = vld [vmem:[#allocation25_spill] sm:$0xff]  ;;  %v2778_v12 = vld [vmem:[#allocation22_spill] sm:$0xff] }
 0x293   : >> { %1042 = vmax.xlane.f32.xlu1 %v1041_v36  ;;  %v1024_v36 = vsel %vm632_vm4, %v2418_v38, -inf }
 0x294   : >> { %v1025_v37 = vmax.f32 %v2435_v8, %v1024_v36  ;;  %v2468_v36 = vadd.f32 %v2772_v5, %v2154_v48  ;;  %v1401_v48 = vld [vmem:[%s2737_s7 + $0x8] sm:$0xff] (%p740_p11) }
 0x297   : >> { %1038 = vmax.xlane.f32.xlu1 %v1037_v22  ;;  %v1020_v22 = vsel %vm632_vm4, %v2429_v15, -inf }
 0x298   : >> { %v1021_v35 = vmax.f32 %v2446_v34, %v1020_v22  ;;  %v2773_v22 = vld [vmem:[#allocation13_spill] sm:$0xff] }
 0x299   : >> { %v2473_v0 = vadd.f32 %v2774_v23, %v2773_v22 }
 0x29b   : >> { %1034 = vmax.xlane.f32.xlu1 %v1033_v16  ;;  %v1016_v16 = vsel %vm632_vm4, %v2440_v9, -inf  ;;  %v1004_v5 = vsel %vm632_vm4, %v2473_v0, -inf }
 0x29c   : >> { %v1017_v21 = vmax.f32 %v2457_v6, %v1016_v16  ;;  %v2775_v16 = vld [vmem:[#allocation8_spill] sm:$0xff] }
 0x29d   : >> { %v2479_v3 = vadd.f32 %v2776_v25, %v2775_v16 }
 0x29f   : >> { %1030 = vmax.xlane.f32.xlu1 %v1029_v39  ;;  %v1012_v39 = vsel %vm632_vm4, %v2451_v7, -inf }
 0x2a3   : >> { %1026 = vmax.xlane.f32.xlu1 %v1025_v37  ;;  %v1013_v37 = vmax.f32 %v2468_v36, %v1012_v39 }
 0x2a7   : >> { %1022 = vmax.xlane.f32.xlu1 %v1021_v35  ;;  %v1008_v35 = vsel %vm632_vm4, %v2462_v24, -inf }
 0x2a8   : >> { %v1009_v11 = vmax.f32 %v2479_v3, %v1008_v35 }
 0x2ab   : >> { %1018 = vmax.xlane.f32.xlu1 %v1017_v21  ;;  %v2777_v21 = vld [vmem:[#allocation7_spill] sm:$0xff] }
 0x2ac   : >> { %v2486_v39 = vadd.f32 %v2778_v12, %v2777_v21 }
 0x2ae   : >> { %v1005_v22 = vmax.f32 %v2486_v39, %v1004_v5 }
 0x2af   : >> { %1014 = vmax.xlane.f32.xlu1 %v1013_v37 }
 0x2b3   : >> { %1010 = vmax.xlane.f32.xlu1 %v1009_v11 }
 0x2b7   : >> { %1006 = vmax.xlane.f32.xlu1 %v1005_v22 }
 0x308   : >> { %v1063_v23 = vpop.xlane.xlu1 %1062 }
 0x309   : >> { %v1097_v13 = vsub.f32 %v2336_v56, %v1063_v23  ;;  %v1096_v18 = vsub.f32 %v2339_v61, %v1063_v23 }
 0x30b   : >> { %v1158_v25 = vmul.f32 1.442695, %v1097_v13  ;;  %v1156_v5 = vmul.f32 1.442695, %v1096_v18 }
 0x30c   : >> { %v1059_v17 = vpop.xlane.xlu1 %1058  ;;  %v1067_v16 = vpop.xlane.xlu0 %1066 }
 0x30d   : >> { %v1098_v37 = vsub.f32 %v2356_v45, %v1067_v16  ;;  %v1099_v35 = vsub.f32 %v2348_v4, %v1067_v16  ;;  %v1095_v12 = vsub.f32 %v2333_v55, %v1059_v17  ;;  %1796 = vpow2.f32 %v1158_v25 }
 0x30e   : >> { %v1094_v22 = vsub.f32 %v2353_v50, %v1059_v17 }
 0x30f   : >> { %v1160_v19 = vmul.f32 1.442695, %v1098_v37  ;;  %v1162_v21 = vmul.f32 1.442695, %v1099_v35  ;;  %v1154_v56 = vmul.f32 1.442695, %v1095_v12 }
 0x310   : >> { %v1055_v11 = vpop.xlane.xlu1 %1054  ;;  %v1152_v13 = vmul.f32 1.442695, %v1094_v22 }
 0x311   : >> { %1798 = vpow2.f32 %v1160_v19  ;;  %v1093_v20 = vsub.f32 %v2345_v10, %v1055_v11  ;;  %v1092_v4 = vsub.f32 %v2368_v42, %v1055_v11 }
 0x312   : >> { %1800 = vpow2.f32 %v1162_v21 }
 0x313   : >> { %1802 = vpow2.f32 %v1156_v5  ;;  %v1150_v61 = vmul.f32 1.442695, %v1093_v20  ;;  %v1148_v16 = vmul.f32 1.442695, %v1092_v4 }
 0x314   : >> { %v1051_v45 = vpop.xlane.xlu1 %1050  ;;  %1804 = vpow2.f32 %v1154_v56 }
 0x315   : >> { %v1091_v55 = vsub.f32 %v2363_v47, %v1051_v45  ;;  %1806 = vpow2.f32 %v1152_v13  ;;  %v1090_v18 = vsub.f32 %v2377_v2, %v1051_v45 }
 0x316   : >> { %1808 = vpow2.f32 %v1150_v61 }
 0x317   : >> { %v1146_v17 = vmul.f32 1.442695, %v1091_v55  ;;  %1810 = vpow2.f32 %v1148_v16  ;;  %v1144_v37 = vmul.f32 1.442695, %v1090_v18 }
 0x318   : >> { %v1047_v23 = vpop.xlane.xlu1 %1046 }
 0x319   : >> { %v1089_v19 = vsub.f32 %v2372_v62, %v1047_v23  ;;  %v1088_v42 = vsub.f32 %v2386_v30, %v1047_v23  ;;  %1812 = vpow2.f32 %v1146_v17 }
 0x31a   : >> { %v2500_v10 = vpop.eup %1796  ;;  %1814 = vpow2.f32 %v1144_v37 }
 0x31b   : >> { %v1142_v20 = vmul.f32 1.442695, %v1089_v19  ;;  %v1140_v62 = vmul.f32 1.442695, %v1088_v42 }
 0x31c   : >> { %v1043_v50 = vpop.xlane.xlu1 %1042 }
 0x31d   : >> { %v1087_v47 = vsub.f32 %v2381_v1, %v1043_v50  ;;  %v1086_v21 = vsub.f32 %v2395_v43, %v1043_v50  ;;  %1816 = vpow2.f32 %v1142_v20  ;;  %v1220_v1 = vsel %vm632_vm4, %v2500_v10, 0.0 }
 0x31e   : >> { %v2503_v25 = vpop.eup %1798  ;;  %1818 = vpow2.f32 %v1140_v62 }
 0x31f   : >> { %v2506_v12 = vpop.eup %1800  ;;  %v1138_v30 = vmul.f32 1.442695, %v1087_v47  ;;  %v1136_v13 = vmul.f32 1.442695, %v1086_v21 }
 0x320   : >> { %v1039_v35 = vpop.xlane.xlu1 %1038  ;;  %v1224_v2 = vsel %vm632_vm4, %v2506_v12, 0.0  ;;  %v2512_v5 = vpop.eup %1802 }
 0x321   : >> { %v1225_v11 = vadd.f32 %v2503_v25, %v1224_v2  ;;  %v1085_v22 = vsub.f32 %v2390_v63, %v1039_v35  ;;  %v2517_v45 = vpop.eup %1804  ;;  %v1084_v4 = vsub.f32 %v2404_v44, %v1039_v35  ;;  %v1221_v43 = vadd.f32 %v2512_v5, %v1220_v1 }
 0x322   : >> { %v2521_v61 = vpop.eup %1806  ;;  %1820 = vpow2.f32 %v1138_v30  ;;  %v1216_v16 = vsel %vm632_vm4, %v2517_v45, 0.0 }
 0x323   : >> { %1226 = vadd.xlane.f32.xlu1 %v1225_v11  ;;  %v1134_v55 = vmul.f32 1.442695, %v1085_v22  ;;  %v2526_v18 = vpop.eup %1808  ;;  %1822 = vpow2.f32 %v1136_v13  ;;  %v1132_v17 = vmul.f32 1.442695, %v1084_v4  ;;  %v1217_v44 = vadd.f32 %v2521_v61, %v1216_v16 }
 0x324   : >> { %v1035_v56 = vpop.xlane.xlu1 %1034  ;;  %v2530_v50 = vpop.eup %1810  ;;  %v1212_v20 = vsel %vm632_vm4, %v2526_v18, 0.0 }
 0x325   : >> { %v1083_v23 = vsub.f32 %v2399_v46, %v1035_v56  ;;  %v1082_v19 = vsub.f32 %v2413_v41, %v1035_v56  ;;  %1824 = vpow2.f32 %v1134_v55  ;;  %v1213_v41 = vadd.f32 %v2530_v50, %v1212_v20 }
 0x326   : >> { %v2535_v47 = vpop.eup %1812  ;;  %1826 = vpow2.f32 %v1132_v17 }
 0x327   : >> { %1222 = vadd.xlane.f32.xlu1 %v1221_v43  ;;  %v1130_v37 = vmul.f32 1.442695, %v1083_v23  ;;  %v1128_v35 = vmul.f32 1.442695, %v1082_v19  ;;  %v2539_v62 = vpop.eup %1814  ;;  %v1208_v30 = vsel %vm632_vm4, %v2535_v47, 0.0 }
 0x328   : >> { %v1031_v63 = vpop.xlane.xlu1 %1030 }
 0x329   : >> { %v1081_v42 = vsub.f32 %v2408_v40, %v1031_v63  ;;  %v1080_v2 = vsub.f32 %v2424_v14, %v1031_v63  ;;  %1828 = vpow2.f32 %v1130_v37  ;;  %v1209_v14 = vadd.f32 %v2539_v62, %v1208_v30 }
 0x32a   : >> { %v2544_v22 = vpop.eup %1816  ;;  %1830 = vpow2.f32 %v1128_v35 }
 0x32b   : >> { %1218 = vadd.xlane.f32.xlu1 %v1217_v44  ;;  %v1126_v21 = vmul.f32 1.442695, %v1081_v42  ;;  %v1124_v1 = vmul.f32 1.442695, %v1080_v2  ;;  %v2548_v13 = vpop.eup %1818  ;;  %v1204_v55 = vsel %vm632_vm4, %v2544_v22, 0.0 }
 0x32c   : >> { %v1027_v46 = vpop.xlane.xlu1 %1026  ;;  %v1205_v16 = vadd.f32 %v2548_v13, %v1204_v55 }
 0x32d   : >> { %v1079_v11 = vsub.f32 %v2418_v38, %v1027_v46  ;;  %v1078_v56 = vsub.f32 %v2435_v8, %v1027_v46  ;;  %1832 = vpow2.f32 %v1126_v21 }
 0x32e   : >> { %1834 = vpow2.f32 %v1124_v1 }
 0x32f   : >> { %1214 = vadd.xlane.f32.xlu1 %v1213_v41  ;;  %v1122_v4 = vmul.f32 1.442695, %v1079_v11  ;;  %v2553_v23 = vpop.eup %1820  ;;  %v1120_v63 = vmul.f32 1.442695, %v1078_v56 }
 0x330   : >> { %v1023_v40 = vpop.xlane.xlu1 %1022  ;;  %v2557_v17 = vpop.eup %1822  ;;  %v1200_v37 = vsel %vm632_vm4, %v2553_v23, 0.0 }
 0x331   : >> { %v1077_v43 = vsub.f32 %v2429_v15, %v1023_v40  ;;  %v1076_v8 = vsub.f32 %v2446_v34, %v1023_v40  ;;  %1836 = vpow2.f32 %v1122_v4  ;;  %v1201_v21 = vadd.f32 %v2557_v17, %v1200_v37 }
 0x332   : >> { %v2562_v42 = vpop.eup %1824  ;;  %1838 = vpow2.f32 %v1120_v63 }
 0x333   : >> { %1210 = vadd.xlane.f32.xlu1 %v1209_v14  ;;  %v1118_v19 = vmul.f32 1.442695, %v1077_v43  ;;  %v1116_v35 = vmul.f32 1.442695, %v1076_v8  ;;  %v1196_v30 = vsel %vm632_vm4, %v2562_v42, 0.0 }
 0x334   : >> { %v1019_v38 = vpop.xlane.xlu1 %1018 }
 0x335   : >> { %v1075_v44 = vsub.f32 %v2440_v9, %v1019_v38  ;;  %v1074_v34 = vsub.f32 %v2457_v6, %v1019_v38  ;;  %v2568_v9 = vpop.eup %1826  ;;  %1840 = vpow2.f32 %v1118_v19 }
 0x336   : >> { %v2572_v56 = vpop.eup %1828  ;;  %v1197_v1 = vadd.f32 %v2568_v9, %v1196_v30 }
 0x337   : >> { %1206 = vadd.xlane.f32.xlu1 %v1205_v16  ;;  %v1114_v11 = vmul.f32 1.442695, %v1075_v44  ;;  %v1112_v6 = vmul.f32 1.442695, %v1074_v34  ;;  %v2577_v14 = vpop.eup %1830  ;;  %v1192_v38 = vsel %vm632_vm4, %v2572_v56, 0.0 }
 0x338   : >> { %v1015_v15 = vpop.xlane.xlu1 %1014  ;;  %v1193_v19 = vadd.f32 %v2577_v14, %v1192_v38 }
 0x339   : >> { %v1072_v46 = vsub.f32 %v2468_v36, %v1015_v15  ;;  %v1073_v20 = vsub.f32 %v2451_v7, %v1015_v15 }
 0x33a   : >> { %v2581_v55 = vpop.eup %1832 }
 0x33b   : >> { %v1108_v2 = vmul.f32 1.442695, %v1072_v46  ;;  %v1110_v41 = vmul.f32 1.442695, %v1073_v20  ;;  %1202 = vadd.xlane.f32.xlu1 %v1201_v21  ;;  %v2586_v44 = vpop.eup %1834  ;;  %v1188_v15 = vsel %vm632_vm4, %v2581_v55, 0.0 }
 0x33c   : >> { %v1011_v40 = vpop.xlane.xlu1 %1010 }
 0x33d   : >> { %1842 = vpow2.f32 %v1108_v2  ;;  %v1071_v7 = vsub.f32 %v2462_v24, %v1011_v40  ;;  %v1070_v36 = vsub.f32 %v2479_v3, %v1011_v40 }
 0x33e   : >> { %1844 = vpow2.f32 %v1110_v41  ;;  %v2590_v37 = vpop.eup %1836 }
 0x33f   : >> { %1846 = vpow2.f32 %v1116_v35  ;;  %v1106_v4 = vmul.f32 1.442695, %v1071_v7  ;;  %1198 = vadd.xlane.f32.xlu1 %v1197_v1  ;;  %v1104_v8 = vmul.f32 1.442695, %v1070_v36  ;;  %v1184_v46 = vsel %vm632_vm4, %v2590_v37, 0.0 }
 0x340   : >> { %1848 = vpow2.f32 %v1114_v11  ;;  %v1007_v43 = vpop.xlane.xlu1 %1006 }
 0x341   : >> { %v1068_v24 = vsub.f32 %v2486_v39, %v1007_v43  ;;  %v1069_v63 = vsub.f32 %v2473_v0, %v1007_v43  ;;  %1850 = vpow2.f32 %v1112_v6  ;;  %v2592_v39 = vpop.eup %1838  ;;  %v1189_v0 = vadd.f32 %v2586_v44, %v1188_v15 }
 0x342   : >> { %1852 = vpow2.f32 %v1106_v4  ;;  %v2597_v20 = vpop.eup %1840  ;;  %v1185_v2 = vadd.f32 %v2592_v39, %v1184_v46 }
 0x343   : >> { %v1100_v3 = vmul.f32 1.442695, %v1068_v24  ;;  %v1102_v16 = vmul.f32 1.442695, %v1069_v63  ;;  %1194 = vadd.xlane.f32.xlu1 %v1193_v19  ;;  %v1180_v11 = vsel %vm632_vm4, %v2597_v20, 0.0  ;;  %v761_v19 = vld [vmem:[%s2634_s28 + $0x8] sm:$0xff] }
 0x344   : >> { %1705 = vmatprep.mubr.msk.f32.mxu1 %vm632_vm4, %v761_v19 }
 0x345   : >> { %1854 = vpow2.f32 %v1100_v3 }
 0x346   : >> { %1856 = vpow2.f32 %v1102_v16 }
 0x347   : >> { %1858 = vpow2.f32 %v1104_v8  ;;  %1190 = vadd.xlane.f32.xlu1 %v1189_v0 }
 0x34a   : >> { %v2599_v34 = vpop.eup %1842 }
 0x34b   : >> { %v2601_v35 = vpop.eup %1844  ;;  %1186 = vadd.xlane.f32.xlu1 %v1185_v2 }
 0x34c   : >> { %v2604_v41 = vpop.eup %1846  ;;  %v1172_v21 = vsel %vm632_vm4, %v2601_v35, 0.0 }
 0x34d   : >> { %v2610_v40 = vpop.eup %1848  ;;  %v1173_v30 = vadd.f32 %v2599_v34, %v1172_v21  ;;  %v1181_v6 = vadd.f32 %v2604_v41, %v1180_v11 }
 0x34e   : >> { %v2613_v7 = vpop.eup %1850  ;;  %v1176_v36 = vsel %vm632_vm4, %v2610_v40, 0.0 }
 0x34f   : >> { %1174 = vadd.xlane.f32.xlu0 %v1173_v30  ;;  %v2618_v1 = vpop.eup %1852  ;;  %1182 = vadd.xlane.f32.xlu1 %v1181_v6  ;;  %v1177_v38 = vadd.f32 %v2613_v7, %v1176_v36 }
 0x350   : >> { %v1168_v8 = vsel %vm632_vm4, %v2618_v1, 0.0 }
 0x352   : >> { %v2620_v4 = vpop.eup %1854 }
 0x353   : >> { %v2622_v43 = vpop.eup %1856  ;;  %1178 = vadd.xlane.f32.xlu1 %v1177_v38 }
 0x354   : >> { %v2625_v24 = vpop.eup %1858  ;;  %v1164_v63 = vsel %vm632_vm4, %v2622_v43, 0.0 }
 0x355   : >> { %v1165_v3 = vadd.f32 %v2620_v4, %v1164_v63  ;;  %v1169_v16 = vadd.f32 %v2625_v24, %v1168_v8 }
 0x357   : >> { %1166 = vadd.xlane.f32.xlu0 %v1165_v3  ;;  %1170 = vadd.xlane.f32.xlu1 %v1169_v16 }
 0x3ac   : >> { %v1227_v15 = vpop.xlane.xlu1 %1226 }
 0x3ad   : >> { %1860 = vrcp.f32 %v1227_v15 }
 0x3b0   : >> { %v1223_v0 = vpop.xlane.xlu1 %1222 }
 0x3b1   : >> { %1862 = vrcp.f32 %v1223_v0 }
 0x3b4   : >> { %v1219_v46 = vpop.xlane.xlu1 %1218 }
 0x3b5   : >> { %1864 = vrcp.f32 %v1219_v46 }
 0x3b8   : >> { %v1215_v2 = vpop.xlane.xlu1 %1214 }
 0x3b9   : >> { %1866 = vrcp.f32 %v1215_v2 }
 0x3ba   : >> { %v1861_v21 = vpop.eup %1860 }
 0x3bb   : >> { %v1275_v11 = vmul.f32 %v1861_v21, %v2506_v12  ;;  %v1274_v30 = vmul.f32 %v1861_v21, %v2503_v25 }
 0x3bc   : >> { %v1211_v6 = vpop.xlane.xlu1 %1210 }
 0x3bd   : >> { %1868 = vrcp.f32 %v1211_v6  ;;  %1689 = vmatprep.subr.msk.mxu1 %vm632_vm4, %v1275_v11 }
 0x3be   : >> { %v1863_v36 = vpop.eup %1862  ;;  %1328 = vmatpush1.xpose.msra.mxu1 %v1274_v30 }
 0x3bf   : >> { %v1273_v38 = vmul.f32 %v1863_v36, %v2500_v10  ;;  %v1272_v63 = vmul.f32 %v1863_v36, %v2512_v5 }
 0x3c0   : >> { %v1207_v8 = vpop.xlane.xlu1 %1206 }
 0x3c1   : >> { %1870 = vrcp.f32 %v1207_v8  ;;  %1690 = vmatprep.subr.msk.mxu1 %vm632_vm4, %v1273_v38 }
 0x3c2   : >> { %v1865_v3 = vpop.eup %1864  ;;  %1330 = vmatpush1.xpose.msra.mxu1 %v1272_v63 }
 0x3c3   : >> { %v1271_v12 = vmul.f32 %v1865_v3, %v2517_v45  ;;  %v1270_v25 = vmul.f32 %v1865_v3, %v2521_v61 }
 0x3c4   : >> { %v1203_v16 = vpop.xlane.xlu1 %1202 }
 0x3c5   : >> { %1872 = vrcp.f32 %v1203_v16  ;;  %1691 = vmatprep.subr.msk.mxu1 %vm632_vm4, %v1271_v12 }
 0x3c6   : >> { %v1867_v19 = vpop.eup %1866  ;;  %1332 = vmatpush1.xpose.msra.mxu1 %v1270_v25 }
 0x3c7   : >> { %v1269_v10 = vmul.f32 %v1867_v19, %v2526_v18  ;;  %v1268_v5 = vmul.f32 %v1867_v19, %v2530_v50 }
 0x3c8   : >> { %v1199_v15 = vpop.xlane.xlu1 %1198 }
 0x3c9   : >> { %1874 = vrcp.f32 %v1199_v15  ;;  %1692 = vmatprep.subr.msk.mxu1 %vm632_vm4, %v1269_v10 }
 0x3ca   : >> { %v1869_v0 = vpop.eup %1868  ;;  %1334 = vmatpush1.xpose.msra.mxu1 %v1268_v5 }
 0x3cb   : >> { %v1267_v45 = vmul.f32 %v1869_v0, %v2535_v47  ;;  %v1266_v61 = vmul.f32 %v1869_v0, %v2539_v62 }
 0x3cc   : >> { %v1195_v46 = vpop.xlane.xlu1 %1194 }
 0x3cd   : >> { %1876 = vrcp.f32 %v1195_v46  ;;  %1693 = vmatprep.subr.msk.mxu1 %vm632_vm4, %v1267_v45 }
 0x3ce   : >> { %v1871_v2 = vpop.eup %1870  ;;  %1336 = vmatpush1.xpose.msra.mxu1 %v1266_v61  ;;  %v760_v61 = vld [vmem:[%s2634_s28] sm:$0xff] }
 0x3cf   : >> { %v1265_v18 = vmul.f32 %v1871_v2, %v2544_v22  ;;  %v1264_v50 = vmul.f32 %v1871_v2, %v2548_v13 }
 0x3d0   : >> { %v1191_v21 = vpop.xlane.xlu1 %1190 }
 0x3d1   : >> { %1878 = vrcp.f32 %v1191_v21  ;;  %1694 = vmatprep.subr.msk.mxu1 %vm632_vm4, %v1265_v18  ;;  %v1405_v18 = vld [vmem:[%s2738_s8] sm:$0xff] (%p740_p11) }
 0x3d2   : >> { %v1873_v11 = vpop.eup %1872  ;;  %1338 = vmatpush1.xpose.msra.mxu1 %v1264_v50  ;;  %1509 = vperm.xlu1 (%p740_p11), %1893, %v1405_v18  }
 0x3d3   : >> { %v1263_v47 = vmul.f32 %v1873_v11, %v2553_v23  ;;  %v1262_v62 = vmul.f32 %v1873_v11, %v2557_v17 }
 0x3d4   : >> { %v1187_v30 = vpop.xlane.xlu1 %1186 }
 0x3d5   : >> { %1880 = vrcp.f32 %v1187_v30  ;;  %1695 = vmatprep.subr.msk.mxu1 %vm632_vm4, %v1263_v47 }
 0x3d6   : >> { %v1875_v6 = vpop.eup %1874  ;;  %1340 = vmatpush1.xpose.msra.mxu1 %v1262_v62  ;;  %1513 = vperm.xlu1 (%p740_p11), %1893, %v1406_v51  }
 0x3d7   : >> { %v1261_v22 = vmul.f32 %v1875_v6, %v2562_v42  ;;  %v1260_v13 = vmul.f32 %v1875_v6, %v2568_v9 }
 0x3d8   : >> { %v1183_v36 = vpop.xlane.xlu1 %1182  ;;  %v1175_v38 = vpop.xlane.xlu0 %1174 }
 0x3d9   : >> { %1882 = vrcp.f32 %v1183_v36  ;;  %1696 = vmatprep.subr.msk.mxu1 %vm632_vm4, %v1261_v22 }
 0x3da   : >> { %v1877_v63 = vpop.eup %1876  ;;  %1342 = vmatpush1.xpose.msra.mxu1 %v1260_v13  ;;  %1884 = vrcp.f32 %v1175_v38 }
 0x3db   : >> { %v1259_v23 = vmul.f32 %v1877_v63, %v2572_v56  ;;  %v1258_v17 = vmul.f32 %v1877_v63, %v2577_v14 }
 0x3dc   : >> { %v1179_v8 = vpop.xlane.xlu1 %1178 }
 0x3dd   : >> { %1886 = vrcp.f32 %v1179_v8  ;;  %1697 = vmatprep.subr.msk.mxu1 %vm632_vm4, %v1259_v23 }
 0x3de   : >> { %v1879_v3 = vpop.eup %1878  ;;  %1344 = vmatpush1.xpose.msra.mxu1 %v1258_v17 }
 0x3df   : >> { %v1257_v42 = vmul.f32 %v1879_v3, %v2581_v55  ;;  %v1256_v9 = vmul.f32 %v1879_v3, %v2586_v44 }
 0x3e0   : >> { %v1171_v12 = vpop.xlane.xlu1 %1170  ;;  %v1167_v16 = vpop.xlane.xlu0 %1166 }
 0x3e1   : >> { %1888 = vrcp.f32 %v1171_v12  ;;  %1698 = vmatprep.subr.msk.mxu1 %vm632_vm4, %v1257_v42 }
 0x3e2   : >> { %v1881_v25 = vpop.eup %1880  ;;  %1346 = vmatpush1.xpose.msra.mxu1 %v1256_v9  ;;  %1890 = vrcp.f32 %v1167_v16 }
 0x3e3   : >> { %v1255_v56 = vmul.f32 %v1881_v25, %v2590_v37  ;;  %v1254_v14 = vmul.f32 %v1881_v25, %v2592_v39 }
 0x3e5   : >> { %1699 = vmatprep.subr.msk.mxu1 %vm632_vm4, %v1255_v56 }
 0x3e6   : >> { %v1883_v19 = vpop.eup %1882  ;;  %1348 = vmatpush1.xpose.msra.mxu1 %v1254_v14 }
 0x3e7   : >> { %v1253_v55 = vmul.f32 %v1883_v19, %v2597_v20  ;;  %v1252_v44 = vmul.f32 %v1883_v19, %v2604_v41  ;;  %v1885_v10 = vpop.eup %1884 }
 0x3e8   : >> { %v1249_v39 = vmul.f32 %v1885_v10, %v2601_v35  ;;  %v1248_v20 = vmul.f32 %v1885_v10, %v2599_v34 }
 0x3e9   : >> { %1700 = vmatprep.subr.msk.mxu1 %vm632_vm4, %v1253_v55 }
 0x3ea   : >> { %v1887_v5 = vpop.eup %1886  ;;  %1350 = vmatpush1.xpose.msra.mxu1 %v1252_v44 }
 0x3eb   : >> { %v1251_v15 = vmul.f32 %v1887_v5, %v2610_v40  ;;  %v1250_v37 = vmul.f32 %v1887_v5, %v2613_v7 }
 0x3ed   : >> { %1701 = vmatprep.subr.msk.mxu1 %vm632_vm4, %v1251_v15 }
 0x3ee   : >> { %v1889_v0 = vpop.eup %1888  ;;  %1352 = vmatpush1.xpose.msra.mxu1 %v1250_v37 }
 0x3ef   : >> { %1702 = vmatprep.subr.msk.mxu1 %vm632_vm4, %v1249_v39  ;;  %v1247_v41 = vmul.f32 %v1889_v0, %v2618_v1  ;;  %v1891_v45 = vpop.eup %1890  ;;  %v1246_v40 = vmul.f32 %v1889_v0, %v2625_v24  ;;  %v1931_v24 = vmov (%p740_p11), 0  }
 0x3f0   : >> { %v1245_v7 = vmul.f32 %v1891_v45, %v2622_v43  ;;  %v1244_v35 = vmul.f32 %v1891_v45, %v2620_v4  ;;  %v1400_v4 = vld [vmem:[%s2737_s7] sm:$0xff] (%p740_p11)  ;;  %1892 = vset.pattern.permute.xlu0 (%p740_p11), %v1931_v24 }
 0x3f1   : > { %1747 = vmatprep.mubr.msk.f32.mxu0 (%p740_p11), %vm1417_vm6, %v1400_v4  ;;  %1409 = vperm.xlu0 (%p740_p11), %1892, %v1405_v18  }
 0x3f2   : >> { %1354 = vmatpush1.xpose.msra.mxu1 %v1248_v20 }
 0x3f3   : >> { %1703 = vmatprep.subr.msk.mxu1 %vm632_vm4, %v1247_v41 }
 0x3f5   : > { %1414 = vperm.xlu0 (%p740_p11), %1892, %v1406_v51  }
 0x3f6   : >> { %1356 = vmatpush1.xpose.msra.mxu1 %v1246_v40 }
 0x3f7   : >> { %1704 = vmatprep.subr.msk.mxu1 %vm632_vm4, %v1245_v7 }
 0x3f9   : > { %1894 = vset.pattern.permute.xlu0 (%p740_p11), %v1932_v49 }
 0x3fa   : >> { %1358 = vmatpush1.xpose.msra.mxu1 %v1244_v35 }
 0x3fd   : >> { %1392 = vmatmul.mubr.f32.vlgmr.msra.gmra.mxu1 %v760_v61 }
 0x44d   : > { %v1510_v53 = vpop.permute.xlu1 (%p740_p11), %1509 }
 0x451   : > { %v1514_v28 = vpop.permute.xlu1 (%p740_p11), %1513 }
 0x46c   : > { %v1410_v52 = vpop.permute.xlu0 (%p740_p11), %1409 }
 0x470   : > { %v1415_v54 = vpop.permute.xlu0 (%p740_p11), %1414 }
 0x4bc   : > { %742 = sbr.rel (!%p740_p11) target bundleno = 255 (0xff), region = 183 }
 0x4bd   : >> { %v1393_v34 = vpop.f32.mrf.mxu1 }
 0x4be   : >> { %v1397_v46 = vmax.f32 %v1393_v34, 0.0 }
 0x4bf   : >> { %v1395_v2 = vpop.f32.mrf.mxu1 }
 0x4c0   : >> { %1399 = vst [vmem:[%s1398_s29] sm:$0xff] %v1397_v46 }
 0x4c1   : > { %s1710_s26 = sshll.u32 (%p2014_p5), %s1999_s12, 3 }
 0x4c2   : > { %s1528_s28 = scalar_lea.vmem (%p2014_p5), %s2739_s9, %s1710_s26 }
 0x4c7   : > { %v1404_v1 = vld [vmem:[#allocation4 + $0x10] sm:$0xff]  ;;  %v1403_v43 = vld [vmem:[#allocation4 + $0x8] sm:$0xff]  ;;  %v1402_v50 = vld [vmem:[#allocation4] sm:$0xff] }
 0x4c8   : > { %1741 = vmatprep.subr.mxu0 %v1404_v1 }
 0x4c9   : > { %1742 = vmatpush3.msra.mxu0 %v1404_v1 }
 0x4ca   : > { %1743 = vmatprep.subr.mxu0 %v1403_v43 }
 0x4cb   : > { %1744 = vmatpush3.msra.mxu0 %v1403_v43 }
 0x4cc   : > { %1745 = vmatprep.subr.mxu0 %v1402_v50 }
 0x4cd   : > { %1746 = vmatpush3.msra.mxu0 %v1402_v50 }
 0x4ce   : > { %1748 = vmatmul.mubr.msk.f32.vlgmr.msra.gmra.mxu0 %vm1417_vm6, %v1401_v48 }
 0x58e   : > { %v1749_v57 = vpop.f32.mrf.mxu0 }
 0x58f   : > { %v1496_v59 = vadd.f32 %v1749_v57, %v1415_v54 }
 0x590   : > { %v1490_v60 = vpop.f32.mrf.mxu0 }
 0x591   : > { %v1507_v26 = vmul.f32 %v1708_v58, %v1496_v59  ;;  %v1491_v27 = vadd.f32 %v1490_v60, %v1410_v52 }
 0x593   : > { %v1517_v29 = vadd.f32 %v1514_v28, %v1507_v26  ;;  %v1506_v31 = vmul.f32 %v1708_v58, %v1491_v27  ;;  %1526 = sbr.rel (!%p2014_p5) target bundleno = 1440 (0x5a0), region = 105 }
 0x595   : > { %1519 = vst [vmem:[%s2278_s15 + $0x8] sm:$0xff] %v1517_v29  ;;  %v1516_v32 = vadd.f32 %v1510_v53, %v1506_v31 }
 0x597   : > { %1518 = vst [vmem:[%s2278_s15] sm:$0xff] %v1516_v32 }
 0x59c   : > { %v1561_v21 = vld [vmem:[%s2278_s15 + $0x8] sm:$0xff] }
 0x59d   : > { %1562 = vst [vmem:[%s1528_s28 + $0x18] sm:$0xff] %v1561_v21 }
 0x59e   : > { %v1559_v33 = vld [vmem:[%s2278_s15] sm:$0xff] }
 0x59f   : > { %1560 = vst [vmem:[%s1528_s28] sm:$0xff] %v1559_v33 }
 0x5a0 PF: > { %p16_p12 = scmp.ge.s32.totalorder %s2002_s13, 5   ;;  %s2779_s30 = smov %s1917_s10 }
 0x5a1   : > { %s2780_s10 = smov %s2012_s16  ;;  %s2781_s11 = smov %s2002_s13 }
 0x5a2   :  { %18 = sbr.rel (!%p16_p12) target bundleno = 2 (0x2), region = 194 }

</bundles_post_ra>
